<compile_context>
chip_gen: v7x
topology: tpu7x:2x2x1
jax: 0.10.0
libtpu: 0.0.40
codegen_flags: <defaults>
</compile_context>

<pallas_src>
import functools
import math

import jax
import jax.numpy as jnp
from jax.experimental import pallas as pl
from jax.experimental.pallas import tpu as pltpu


def encoder_layer_kernel(src_ref,
                         wqkv_ref, bqkv_ref,
                         wo_ref, bo_ref,
                         w1_ref, b1_ref, w2_ref, b2_ref,
                         g1_ref, beta1_ref, g2_ref, beta2_ref,
                         out_ref,
                         *, num_heads, ln_eps, ffn_chunk):
    Bb, T, D = src_ref.shape
    hd = D // num_heads
    cdt = src_ref.dtype                       # compute dtype (bf16 or f32)

    x = src_ref[...]                          # (Bb, T, D)
    x2 = x.reshape(Bb * T, D)                 # flatten batch rows into MXU M dim

    # --- fused Q/K/V projection: one MXU pass, f32 accumulation ---
    qkv = jnp.dot(x2, wqkv_ref[...],
                  preferred_element_type=jnp.float32) + bqkv_ref[...]   # (M, 3D) f32

    inv_scale = 1.0 / math.sqrt(hd)

    # --- per-batch, per-head attention with wo folded into the head loop ---
    attn_rows = []
    for b in range(Bb):                       # static unrolled loops (small Bb, H)
        r0 = b * T
        attn_b = None
        for h in range(num_heads):
            qlo = h * hd
            klo = D + h * hd
            vlo = 2 * D + h * hd
            qh = (qkv[r0:r0 + T, qlo:qlo + hd] * inv_scale).astype(cdt)
            kh = qkv[r0:r0 + T, klo:klo + hd].astype(cdt)
            vh = qkv[r0:r0 + T, vlo:vlo + hd].astype(cdt)

            s = jnp.dot(qh, kh.T, preferred_element_type=jnp.float32)   # (T, T) f32
            m = jnp.max(s, axis=-1, keepdims=True)
            p = jnp.exp(s - m)                                          # un-normalized
            l = jnp.sum(p, axis=-1, keepdims=True)                      # (T, 1)

            oh = jnp.dot(p.astype(cdt), vh,
                         preferred_element_type=jnp.float32)            # (T, hd) f32
            oh = oh * pl.reciprocal(l, approx=True)                     # deferred softmax denom

            # fold output projection: sublane slice of wo is a cheap static slice
            contrib = jnp.dot(oh.astype(cdt), wo_ref[qlo:qlo + hd, :],
                              preferred_element_type=jnp.float32)       # (T, D)
            attn_b = contrib if attn_b is None else attn_b + contrib
        attn_rows.append(attn_b)
    attn = (attn_rows[0] if Bb == 1
            else jnp.concatenate(attn_rows, axis=0)) + bo_ref[...]      # (M, D) f32

    # --- residual + LayerNorm 1 (f32) ---
    h1 = x2.astype(jnp.float32) + attn
    mu1 = jnp.mean(h1, axis=-1, keepdims=True)
    var1 = jnp.mean((h1 - mu1) ** 2, axis=-1, keepdims=True)
    h1n = (h1 - mu1) * jax.lax.rsqrt(var1 + ln_eps) * g1_ref[...] + beta1_ref[...]

    # --- feed-forward: Linear -> ReLU -> Linear, chunked over DFF ---
    h1c = h1n.astype(cdt)
    DFF = w1_ref.shape[1]
    f = None
    for lo in range(0, DFF, ffn_chunk):
        hi = min(lo + ffn_chunk, DFF)
        g = jnp.dot(h1c, w1_ref[:, lo:hi],
                    preferred_element_type=jnp.float32) + b1_ref[:, lo:hi]
        g = jnp.maximum(g, 0.0).astype(cdt)
        contrib = jnp.dot(g, w2_ref[lo:hi, :],
                          preferred_element_type=jnp.float32)
        f = contrib if f is None else f + contrib
    f = f + b2_ref[...]

    # --- residual + LayerNorm 2 (f32) ---
    h2 = h1n + f
    mu2 = jnp.mean(h2, axis=-1, keepdims=True)
    var2 = jnp.mean((h2 - mu2) ** 2, axis=-1, keepdims=True)
    out = (h2 - mu2) * jax.lax.rsqrt(var2 + ln_eps) * g2_ref[...] + beta2_ref[...]

    out_ref[...] = out.reshape(Bb, T, D).astype(out_ref.dtype)


def transformer_encoder_layer(src, params, *, num_heads, ln_eps=1e-5,
                              compute_dtype=jnp.bfloat16, batch_block=None,
                              ffn_chunk=1024, vmem_limit_bytes=48 * 1024 * 1024):
    B, T, D = src.shape

    if batch_block is None:
        target_rows = 256                       # fill the MXU M dim per grid step
        batch_block = max(1, min(B, max(1, target_rows // max(T, 1))))
        while B % batch_block:
            batch_block -= 1
    assert B % batch_block == 0

    # Host-side one-time fusion / casting (halves HBM traffic in bf16 mode).
    wqkv = jnp.concatenate([params["wq"], params["wk"], params["wv"]],
                           axis=1).astype(compute_dtype)                 # (D, 3D)
    bqkv = jnp.concatenate([params["bq"], params["bk"], params["bv"]],
                           axis=1).astype(jnp.float32)                   # (1, 3D)
    wo = params["wo"].astype(compute_dtype)
    w1 = params["w1"].astype(compute_dtype)
    w2 = params["w2"].astype(compute_dtype)
    bo = params["bo"].astype(jnp.float32)
    b1 = params["b1"].astype(jnp.float32)
    b2 = params["b2"].astype(jnp.float32)
    g1 = params["g1"].astype(jnp.float32)
    beta1 = params["beta1"].astype(jnp.float32)
    g2 = params["g2"].astype(jnp.float32)
    beta2 = params["beta2"].astype(jnp.float32)

    src_c = src.astype(compute_dtype)

    weight_args = [wqkv, bqkv, wo, bo, w1, b1, w2, b2, g1, beta1, g2, beta2]

    kernel = functools.partial(encoder_layer_kernel,
                               num_heads=num_heads,
                               ln_eps=ln_eps,
                               ffn_chunk=ffn_chunk)

    in_specs = [pl.BlockSpec((batch_block, T, D), lambda i: (i, 0, 0))]
    for w in weight_args:
        # Constant index_map -> the weight block is DMA'd once and reused
        # across all batch grid steps (no re-fetch).
        in_specs.append(pl.BlockSpec(w.shape, lambda i: (0, 0)))

    out_spec = pl.BlockSpec((batch_block, T, D), lambda i: (i, 0, 0))

    fn = pl.pallas_call(
        kernel,
        out_shape=jax.ShapeDtypeStruct((B, T, D), src_c.dtype),
        grid_spec=pltpu.PrefetchScalarGridSpec(
            num_scalar_prefetch=0,
            grid=(B // batch_block,),
            in_specs=in_specs,
            out_specs=out_spec,
        ),
        compiler_params=pltpu.CompilerParams(
            dimension_semantics=("parallel",),
            vmem_limit_bytes=vmem_limit_bytes),
    )
    return fn(src_c, *weight_args)


def _linear_params(key, din, dout):
    """Deterministic init mimicking nn.Linear defaults (uniform +-1/sqrt(din))."""
    k1, k2 = jax.random.split(key)
    bound = 1.0 / math.sqrt(din)
    w = jax.random.uniform(k1, (din, dout), jnp.float32, -bound, bound)
    b = jax.random.uniform(k2, (1, dout), jnp.float32, -bound, bound)
    return w, b


def init_params(key, d_model, dim_feedforward):
    keys = jax.random.split(key, 6)
    wq, bq = _linear_params(keys[0], d_model, d_model)
    wk, bk = _linear_params(keys[1], d_model, d_model)
    wv, bv = _linear_params(keys[2], d_model, d_model)
    wo, bo = _linear_params(keys[3], d_model, d_model)
    w1, b1 = _linear_params(keys[4], d_model, dim_feedforward)
    w2, b2 = _linear_params(keys[5], dim_feedforward, d_model)
    return {
        "wq": wq, "bq": bq, "wk": wk, "bk": bk, "wv": wv, "bv": bv,
        "wo": wo, "bo": bo, "w1": w1, "b1": b1, "w2": w2, "b2": b2,
        "g1": jnp.ones((1, d_model), jnp.float32),
        "beta1": jnp.zeros((1, d_model), jnp.float32),
        "g2": jnp.ones((1, d_model), jnp.float32),
        "beta2": jnp.zeros((1, d_model), jnp.float32),
    }


def reference_forward(src, params, *, num_heads, ln_eps=1e-5):
    """Pure-JAX f32 reference mirroring the PyTorch forward (eval mode)."""
    B, T, D = src.shape
    hd = D // num_heads

    def lin(x, w, b):
        return x @ w + b

    q = lin(src, params["wq"], params["bq"]).reshape(B, T, num_heads, hd).transpose(0, 2, 1, 3)
    k = lin(src, params["wk"], params["bk"]).reshape(B, T, num_heads, hd).transpose(0, 2, 1, 3)
    v = lin(src, params["wv"], params["bv"]).reshape(B, T, num_heads, hd).transpose(0, 2, 1, 3)
    s = jnp.einsum("bhqd,bhkd->bhqk", q, k) / math.sqrt(hd)
    p = jax.nn.softmax(s, axis=-1)
    o = jnp.einsum("bhqk,bhkd->bhqd", p, v).transpose(0, 2, 1, 3).reshape(B, T, D)
    attn = lin(o, params["wo"], params["bo"])

    def ln_(x, g, b):
        mu = jnp.mean(x, axis=-1, keepdims=True)
        var = jnp.mean((x - mu) ** 2, axis=-1, keepdims=True)
        return (x - mu) * jax.lax.rsqrt(var + ln_eps) * g + b

    h1 = ln_(src + attn, params["g1"], params["beta1"])
    f = jnp.maximum(lin(h1, params["w1"], params["b1"]), 0.0)
    f = lin(f, params["w2"], params["b2"])
    return ln_(h1 + f, params["g2"], params["beta2"])


if __name__ == "__main__":
    # Small but layout-friendly shapes: D multiple of 128, T multiple of 8.
    B, T, D, H = 4, 16, 128, 4
    DFF = 4 * D  # 512

    root = jax.random.PRNGKey(0)
    k_src, k_par = jax.random.split(root)
    src = jax.random.normal(k_src, (B, T, D), jnp.float32)
    params = init_params(k_par, D, DFF)

    ref = reference_forward(src, params, num_heads=H)

    # f32 compute path (tight check; small slack for approx reciprocal in softmax).
    out_f32 = transformer_encoder_layer(src, params, num_heads=H,
                                        compute_dtype=jnp.float32,
                                        batch_block=2, ffn_chunk=256)
    out_f32 = jax.block_until_ready(out_f32)
    assert out_f32.shape == (B, T, D)
    assert jnp.allclose(out_f32, ref, atol=5e-3, rtol=5e-3), "f32 mismatch vs reference"

    # bf16 compute path (the performance configuration; looser tolerance vs f32 ref).
    out_bf16 = transformer_encoder_layer(src, params, num_heads=H,
                                         compute_dtype=jnp.bfloat16,
                                         batch_block=2, ffn_chunk=256)
    out_bf16 = jax.block_until_ready(out_bf16)
    assert out_bf16.shape == (B, T, D)
    max_err = float(jnp.max(jnp.abs(out_bf16.astype(jnp.float32) - ref)))
    assert max_err < 0.2, f"bf16 mismatch vs reference (max abs err {max_err})"

    print("KERNEL_OK")
</pallas_src>

<mosaic_0001>
module attributes {stable_mosaic.version = 11 : i64} {
  func.func @encoder_layer_kernel(%arg0: i32, %arg1: memref<2x16x128xf32, #tpu.memory_space<vmem>>, %arg2: memref<128x384xf32, #tpu.memory_space<vmem>>, %arg3: memref<1x384xf32, #tpu.memory_space<vmem>>, %arg4: memref<128x128xf32, #tpu.memory_space<vmem>>, %arg5: memref<1x128xf32, #tpu.memory_space<vmem>>, %arg6: memref<128x512xf32, #tpu.memory_space<vmem>>, %arg7: memref<1x512xf32, #tpu.memory_space<vmem>>, %arg8: memref<512x128xf32, #tpu.memory_space<vmem>>, %arg9: memref<1x128xf32, #tpu.memory_space<vmem>>, %arg10: memref<1x128xf32, #tpu.memory_space<vmem>>, %arg11: memref<1x128xf32, #tpu.memory_space<vmem>>, %arg12: memref<1x128xf32, #tpu.memory_space<vmem>>, %arg13: memref<1x128xf32, #tpu.memory_space<vmem>>, %arg14: memref<2x16x128xf32, #tpu.memory_space<vmem>>) attributes {dimension_semantics = [#tpu.dimension_semantics<parallel>], iteration_bounds = array<i64: 2>, scalar_prefetch = 0 : i64, scratch_operands = 0 : i64, tpu.core_type = #tpu.core_type<tc>, window_params = [{transform_indices = @transform_0, window_bounds = array<i64: 2, 16, 128>}, {pipeline_mode = #tpu.pipeline_mode<synchronous>, transform_indices = @transform_1, window_bounds = array<i64: 128, 384>}, {pipeline_mode = #tpu.pipeline_mode<synchronous>, transform_indices = @transform_2, window_bounds = array<i64: 1, 384>}, {pipeline_mode = #tpu.pipeline_mode<synchronous>, transform_indices = @transform_3, window_bounds = array<i64: 128, 128>}, {pipeline_mode = #tpu.pipeline_mode<synchronous>, transform_indices = @transform_4, window_bounds = array<i64: 1, 128>}, {pipeline_mode = #tpu.pipeline_mode<synchronous>, transform_indices = @transform_5, window_bounds = array<i64: 128, 512>}, {pipeline_mode = #tpu.pipeline_mode<synchronous>, transform_indices = @transform_6, window_bounds = array<i64: 1, 512>}, {pipeline_mode = #tpu.pipeline_mode<synchronous>, transform_indices = @transform_7, window_bounds = array<i64: 512, 128>}, {pipeline_mode = #tpu.pipeline_mode<synchronous>, transform_indices = @transform_8, window_bounds = array<i64: 1, 128>}, {pipeline_mode = #tpu.pipeline_mode<synchronous>, transform_indices = @transform_9, window_bounds = array<i64: 1, 128>}, {pipeline_mode = #tpu.pipeline_mode<synchronous>, transform_indices = @transform_10, window_bounds = array<i64: 1, 128>}, {pipeline_mode = #tpu.pipeline_mode<synchronous>, transform_indices = @transform_11, window_bounds = array<i64: 1, 128>}, {pipeline_mode = #tpu.pipeline_mode<synchronous>, transform_indices = @transform_12, window_bounds = array<i64: 1, 128>}, {transform_indices = @transform_13, window_bounds = array<i64: 2, 16, 128>}]} {
    %c0 = arith.constant 0 : index
    %c0_0 = arith.constant 0 : index
    %c0_1 = arith.constant 0 : index
    %0 = vector.load %arg1[%c0, %c0_0, %c0_1] : memref<2x16x128xf32, #tpu.memory_space<vmem>>, vector<2x16x128xf32>
    %1 = vector.shape_cast %0 : vector<2x16x128xf32> to vector<32x128xf32>
    %c0_2 = arith.constant 0 : index
    %c0_3 = arith.constant 0 : index
    %2 = vector.load %arg2[%c0_2, %c0_3] : memref<128x384xf32, #tpu.memory_space<vmem>>, vector<128x384xf32>
    %cst = arith.constant dense<0.000000e+00> : vector<32x384xf32>
    %3 = tpu.matmul %1, %2, %cst {dimension_numbers = #tpu.dot_dimension_numbers<[1], [0], [0], [1], [0, 0, 1, 1], [], []>} : vector<32x128xf32>, vector<128x384xf32>, vector<32x384xf32> -> vector<32x384xf32>
    %c0_4 = arith.constant 0 : index
    %c0_5 = arith.constant 0 : index
    %4 = vector.load %arg3[%c0_4, %c0_5] : memref<1x384xf32, #tpu.memory_space<vmem>>, vector<1x384xf32>
    %5 = vector.broadcast %4 : vector<1x384xf32> to vector<32x384xf32>
    %6 = arith.addf %3, %5 : vector<32x384xf32>
    %7 = vector.extract_strided_slice %6 {offsets = [0, 0], sizes = [16, 32], strides = [1, 1]} : vector<32x384xf32> to vector<16x32xf32>
    %cst_6 = arith.constant 0.176776692 : f32
    %8 = vector.broadcast %cst_6 : f32 to vector<16x32xf32>
    %9 = arith.mulf %7, %8 : vector<16x32xf32>
    %10 = vector.extract_strided_slice %6 {offsets = [0, 128], sizes = [16, 32], strides = [1, 1]} : vector<32x384xf32> to vector<16x32xf32>
    %11 = vector.extract_strided_slice %6 {offsets = [0, 256], sizes = [16, 32], strides = [1, 1]} : vector<32x384xf32> to vector<16x32xf32>
    %12 = tpu.transpose %10, [1, 0] : vector<16x32xf32> -> vector<32x16xf32>
    %cst_7 = arith.constant dense<0.000000e+00> : vector<16x16xf32>
    %13 = tpu.matmul %9, %12, %cst_7 {dimension_numbers = #tpu.dot_dimension_numbers<[1], [0], [0], [1], [0, 0, 1, 1], [], []>} : vector<16x32xf32>, vector<32x16xf32>, vector<16x16xf32> -> vector<16x16xf32>
    %cst_8 = arith.constant dense<0xFF800000> : vector<16xf32>
    %14 = vector.multi_reduction <maximumf>, %13, %cst_8 [1] : vector<16x16xf32> to vector<16xf32>
    %15 = vector.shape_cast %14 : vector<16xf32> to vector<16x1xf32>
    %16 = vector.broadcast %15 : vector<16x1xf32> to vector<16x16xf32>
    %17 = arith.subf %13, %16 : vector<16x16xf32>
    %18 = math.exp %17 : vector<16x16xf32>
    %cst_9 = arith.constant dense<0.000000e+00> : vector<16xf32>
    %19 = vector.multi_reduction <add>, %18, %cst_9 [1] : vector<16x16xf32> to vector<16xf32>
    %20 = vector.shape_cast %19 : vector<16xf32> to vector<16x1xf32>
    %cst_10 = arith.constant dense<0.000000e+00> : vector<16x32xf32>
    %21 = tpu.matmul %18, %11, %cst_10 {dimension_numbers = #tpu.dot_dimension_numbers<[1], [0], [0], [1], [0, 0, 1, 1], [], []>} : vector<16x16xf32>, vector<16x32xf32>, vector<16x32xf32> -> vector<16x32xf32>
    %22 = tpu.reciprocal %20 {approx = true} : vector<16x1xf32> -> vector<16x1xf32>
    %23 = vector.broadcast %22 : vector<16x1xf32> to vector<16x32xf32>
    %24 = arith.mulf %21, %23 : vector<16x32xf32>
    %c0_11 = arith.constant 0 : index
    %c0_12 = arith.constant 0 : index
    %25 = vector.load %arg4[%c0_11, %c0_12] : memref<128x128xf32, #tpu.memory_space<vmem>>, vector<32x128xf32>
    %cst_13 = arith.constant dense<0.000000e+00> : vector<16x128xf32>
    %26 = tpu.matmul %24, %25, %cst_13 {dimension_numbers = #tpu.dot_dimension_numbers<[1], [0], [0], [1], [0, 0, 1, 1], [], []>} : vector<16x32xf32>, vector<32x128xf32>, vector<16x128xf32> -> vector<16x128xf32>
    %27 = vector.extract_strided_slice %6 {offsets = [0, 32], sizes = [16, 32], strides = [1, 1]} : vector<32x384xf32> to vector<16x32xf32>
    %cst_14 = arith.constant 0.176776692 : f32
    %28 = vector.broadcast %cst_14 : f32 to vector<16x32xf32>
    %29 = arith.mulf %27, %28 : vector<16x32xf32>
    %30 = vector.extract_strided_slice %6 {offsets = [0, 160], sizes = [16, 32], strides = [1, 1]} : vector<32x384xf32> to vector<16x32xf32>
    %31 = vector.extract_strided_slice %6 {offsets = [0, 288], sizes = [16, 32], strides = [1, 1]} : vector<32x384xf32> to vector<16x32xf32>
    %32 = tpu.transpose %30, [1, 0] : vector<16x32xf32> -> vector<32x16xf32>
    %cst_15 = arith.constant dense<0.000000e+00> : vector<16x16xf32>
    %33 = tpu.matmul %29, %32, %cst_15 {dimension_numbers = #tpu.dot_dimension_numbers<[1], [0], [0], [1], [0, 0, 1, 1], [], []>} : vector<16x32xf32>, vector<32x16xf32>, vector<16x16xf32> -> vector<16x16xf32>
    %cst_16 = arith.constant dense<0xFF800000> : vector<16xf32>
    %34 = vector.multi_reduction <maximumf>, %33, %cst_16 [1] : vector<16x16xf32> to vector<16xf32>
    %35 = vector.shape_cast %34 : vector<16xf32> to vector<16x1xf32>
    %36 = vector.broadcast %35 : vector<16x1xf32> to vector<16x16xf32>
    %37 = arith.subf %33, %36 : vector<16x16xf32>
    %38 = math.exp %37 : vector<16x16xf32>
    %cst_17 = arith.constant dense<0.000000e+00> : vector<16xf32>
    %39 = vector.multi_reduction <add>, %38, %cst_17 [1] : vector<16x16xf32> to vector<16xf32>
    %40 = vector.shape_cast %39 : vector<16xf32> to vector<16x1xf32>
    %cst_18 = arith.constant dense<0.000000e+00> : vector<16x32xf32>
    %41 = tpu.matmul %38, %31, %cst_18 {dimension_numbers = #tpu.dot_dimension_numbers<[1], [0], [0], [1], [0, 0, 1, 1], [], []>} : vector<16x16xf32>, vector<16x32xf32>, vector<16x32xf32> -> vector<16x32xf32>
    %42 = tpu.reciprocal %40 {approx = true} : vector<16x1xf32> -> vector<16x1xf32>
    %43 = vector.broadcast %42 : vector<16x1xf32> to vector<16x32xf32>
    %44 = arith.mulf %41, %43 : vector<16x32xf32>
    %c32 = arith.constant 32 : index
    %c0_19 = arith.constant 0 : index
    %45 = vector.load %arg4[%c32, %c0_19] : memref<128x128xf32, #tpu.memory_space<vmem>>, vector<32x128xf32>
    %cst_20 = arith.constant dense<0.000000e+00> : vector<16x128xf32>
    %46 = tpu.matmul %44, %45, %cst_20 {dimension_numbers = #tpu.dot_dimension_numbers<[1], [0], [0], [1], [0, 0, 1, 1], [], []>} : vector<16x32xf32>, vector<32x128xf32>, vector<16x128xf32> -> vector<16x128xf32>
    %47 = arith.addf %26, %46 : vector<16x128xf32>
    %48 = vector.extract_strided_slice %6 {offsets = [0, 64], sizes = [16, 32], strides = [1, 1]} : vector<32x384xf32> to vector<16x32xf32>
    %cst_21 = arith.constant 0.176776692 : f32
    %49 = vector.broadcast %cst_21 : f32 to vector<16x32xf32>
    %50 = arith.mulf %48, %49 : vector<16x32xf32>
    %51 = vector.extract_strided_slice %6 {offsets = [0, 192], sizes = [16, 32], strides = [1, 1]} : vector<32x384xf32> to vector<16x32xf32>
    %52 = vector.extract_strided_slice %6 {offsets = [0, 320], sizes = [16, 32], strides = [1, 1]} : vector<32x384xf32> to vector<16x32xf32>
    %53 = tpu.transpose %51, [1, 0] : vector<16x32xf32> -> vector<32x16xf32>
    %cst_22 = arith.constant dense<0.000000e+00> : vector<16x16xf32>
    %54 = tpu.matmul %50, %53, %cst_22 {dimension_numbers = #tpu.dot_dimension_numbers<[1], [0], [0], [1], [0, 0, 1, 1], [], []>} : vector<16x32xf32>, vector<32x16xf32>, vector<16x16xf32> -> vector<16x16xf32>
    %cst_23 = arith.constant dense<0xFF800000> : vector<16xf32>
    %55 = vector.multi_reduction <maximumf>, %54, %cst_23 [1] : vector<16x16xf32> to vector<16xf32>
    %56 = vector.shape_cast %55 : vector<16xf32> to vector<16x1xf32>
    %57 = vector.broadcast %56 : vector<16x1xf32> to vector<16x16xf32>
    %58 = arith.subf %54, %57 : vector<16x16xf32>
    %59 = math.exp %58 : vector<16x16xf32>
    %cst_24 = arith.constant dense<0.000000e+00> : vector<16xf32>
    %60 = vector.multi_reduction <add>, %59, %cst_24 [1] : vector<16x16xf32> to vector<16xf32>
    %61 = vector.shape_cast %60 : vector<16xf32> to vector<16x1xf32>
    %cst_25 = arith.constant dense<0.000000e+00> : vector<16x32xf32>
    %62 = tpu.matmul %59, %52, %cst_25 {dimension_numbers = #tpu.dot_dimension_numbers<[1], [0], [0], [1], [0, 0, 1, 1], [], []>} : vector<16x16xf32>, vector<16x32xf32>, vector<16x32xf32> -> vector<16x32xf32>
    %63 = tpu.reciprocal %61 {approx = true} : vector<16x1xf32> -> vector<16x1xf32>
    %64 = vector.broadcast %63 : vector<16x1xf32> to vector<16x32xf32>
    %65 = arith.mulf %62, %64 : vector<16x32xf32>
    %c64 = arith.constant 64 : index
    %c0_26 = arith.constant 0 : index
    %66 = vector.load %arg4[%c64, %c0_26] : memref<128x128xf32, #tpu.memory_space<vmem>>, vector<32x128xf32>
    %cst_27 = arith.constant dense<0.000000e+00> : vector<16x128xf32>
    %67 = tpu.matmul %65, %66, %cst_27 {dimension_numbers = #tpu.dot_dimension_numbers<[1], [0], [0], [1], [0, 0, 1, 1], [], []>} : vector<16x32xf32>, vector<32x128xf32>, vector<16x128xf32> -> vector<16x128xf32>
    %68 = arith.addf %47, %67 : vector<16x128xf32>
    %69 = vector.extract_strided_slice %6 {offsets = [0, 96], sizes = [16, 32], strides = [1, 1]} : vector<32x384xf32> to vector<16x32xf32>
    %cst_28 = arith.constant 0.176776692 : f32
    %70 = vector.broadcast %cst_28 : f32 to vector<16x32xf32>
    %71 = arith.mulf %69, %70 : vector<16x32xf32>
    %72 = vector.extract_strided_slice %6 {offsets = [0, 224], sizes = [16, 32], strides = [1, 1]} : vector<32x384xf32> to vector<16x32xf32>
    %73 = vector.extract_strided_slice %6 {offsets = [0, 352], sizes = [16, 32], strides = [1, 1]} : vector<32x384xf32> to vector<16x32xf32>
    %74 = tpu.transpose %72, [1, 0] : vector<16x32xf32> -> vector<32x16xf32>
    %cst_29 = arith.constant dense<0.000000e+00> : vector<16x16xf32>
    %75 = tpu.matmul %71, %74, %cst_29 {dimension_numbers = #tpu.dot_dimension_numbers<[1], [0], [0], [1], [0, 0, 1, 1], [], []>} : vector<16x32xf32>, vector<32x16xf32>, vector<16x16xf32> -> vector<16x16xf32>
    %cst_30 = arith.constant dense<0xFF800000> : vector<16xf32>
    %76 = vector.multi_reduction <maximumf>, %75, %cst_30 [1] : vector<16x16xf32> to vector<16xf32>
    %77 = vector.shape_cast %76 : vector<16xf32> to vector<16x1xf32>
    %78 = vector.broadcast %77 : vector<16x1xf32> to vector<16x16xf32>
    %79 = arith.subf %75, %78 : vector<16x16xf32>
    %80 = math.exp %79 : vector<16x16xf32>
    %cst_31 = arith.constant dense<0.000000e+00> : vector<16xf32>
    %81 = vector.multi_reduction <add>, %80, %cst_31 [1] : vector<16x16xf32> to vector<16xf32>
    %82 = vector.shape_cast %81 : vector<16xf32> to vector<16x1xf32>
    %cst_32 = arith.constant dense<0.000000e+00> : vector<16x32xf32>
    %83 = tpu.matmul %80, %73, %cst_32 {dimension_numbers = #tpu.dot_dimension_numbers<[1], [0], [0], [1], [0, 0, 1, 1], [], []>} : vector<16x16xf32>, vector<16x32xf32>, vector<16x32xf32> -> vector<16x32xf32>
    %84 = tpu.reciprocal %82 {approx = true} : vector<16x1xf32> -> vector<16x1xf32>
    %85 = vector.broadcast %84 : vector<16x1xf32> to vector<16x32xf32>
    %86 = arith.mulf %83, %85 : vector<16x32xf32>
    %c96 = arith.constant 96 : index
    %c0_33 = arith.constant 0 : index
    %87 = vector.load %arg4[%c96, %c0_33] : memref<128x128xf32, #tpu.memory_space<vmem>>, vector<32x128xf32>
    %cst_34 = arith.constant dense<0.000000e+00> : vector<16x128xf32>
    %88 = tpu.matmul %86, %87, %cst_34 {dimension_numbers = #tpu.dot_dimension_numbers<[1], [0], [0], [1], [0, 0, 1, 1], [], []>} : vector<16x32xf32>, vector<32x128xf32>, vector<16x128xf32> -> vector<16x128xf32>
    %89 = arith.addf %68, %88 : vector<16x128xf32>
    %90 = vector.extract_strided_slice %6 {offsets = [16, 0], sizes = [16, 32], strides = [1, 1]} : vector<32x384xf32> to vector<16x32xf32>
    %cst_35 = arith.constant 0.176776692 : f32
    %91 = vector.broadcast %cst_35 : f32 to vector<16x32xf32>
    %92 = arith.mulf %90, %91 : vector<16x32xf32>
    %93 = vector.extract_strided_slice %6 {offsets = [16, 128], sizes = [16, 32], strides = [1, 1]} : vector<32x384xf32> to vector<16x32xf32>
    %94 = vector.extract_strided_slice %6 {offsets = [16, 256], sizes = [16, 32], strides = [1, 1]} : vector<32x384xf32> to vector<16x32xf32>
    %95 = tpu.transpose %93, [1, 0] : vector<16x32xf32> -> vector<32x16xf32>
    %cst_36 = arith.constant dense<0.000000e+00> : vector<16x16xf32>
    %96 = tpu.matmul %92, %95, %cst_36 {dimension_numbers = #tpu.dot_dimension_numbers<[1], [0], [0], [1], [0, 0, 1, 1], [], []>} : vector<16x32xf32>, vector<32x16xf32>, vector<16x16xf32> -> vector<16x16xf32>
    %cst_37 = arith.constant dense<0xFF800000> : vector<16xf32>
    %97 = vector.multi_reduction <maximumf>, %96, %cst_37 [1] : vector<16x16xf32> to vector<16xf32>
    %98 = vector.shape_cast %97 : vector<16xf32> to vector<16x1xf32>
    %99 = vector.broadcast %98 : vector<16x1xf32> to vector<16x16xf32>
    %100 = arith.subf %96, %99 : vector<16x16xf32>
    %101 = math.exp %100 : vector<16x16xf32>
    %cst_38 = arith.constant dense<0.000000e+00> : vector<16xf32>
    %102 = vector.multi_reduction <add>, %101, %cst_38 [1] : vector<16x16xf32> to vector<16xf32>
    %103 = vector.shape_cast %102 : vector<16xf32> to vector<16x1xf32>
    %cst_39 = arith.constant dense<0.000000e+00> : vector<16x32xf32>
    %104 = tpu.matmul %101, %94, %cst_39 {dimension_numbers = #tpu.dot_dimension_numbers<[1], [0], [0], [1], [0, 0, 1, 1], [], []>} : vector<16x16xf32>, vector<16x32xf32>, vector<16x32xf32> -> vector<16x32xf32>
    %105 = tpu.reciprocal %103 {approx = true} : vector<16x1xf32> -> vector<16x1xf32>
    %106 = vector.broadcast %105 : vector<16x1xf32> to vector<16x32xf32>
    %107 = arith.mulf %104, %106 : vector<16x32xf32>
    %c0_40 = arith.constant 0 : index
    %c0_41 = arith.constant 0 : index
    %108 = vector.load %arg4[%c0_40, %c0_41] : memref<128x128xf32, #tpu.memory_space<vmem>>, vector<32x128xf32>
    %cst_42 = arith.constant dense<0.000000e+00> : vector<16x128xf32>
    %109 = tpu.matmul %107, %108, %cst_42 {dimension_numbers = #tpu.dot_dimension_numbers<[1], [0], [0], [1], [0, 0, 1, 1], [], []>} : vector<16x32xf32>, vector<32x128xf32>, vector<16x128xf32> -> vector<16x128xf32>
    %110 = vector.extract_strided_slice %6 {offsets = [16, 32], sizes = [16, 32], strides = [1, 1]} : vector<32x384xf32> to vector<16x32xf32>
    %cst_43 = arith.constant 0.176776692 : f32
    %111 = vector.broadcast %cst_43 : f32 to vector<16x32xf32>
    %112 = arith.mulf %110, %111 : vector<16x32xf32>
    %113 = vector.extract_strided_slice %6 {offsets = [16, 160], sizes = [16, 32], strides = [1, 1]} : vector<32x384xf32> to vector<16x32xf32>
    %114 = vector.extract_strided_slice %6 {offsets = [16, 288], sizes = [16, 32], strides = [1, 1]} : vector<32x384xf32> to vector<16x32xf32>
    %115 = tpu.transpose %113, [1, 0] : vector<16x32xf32> -> vector<32x16xf32>
    %cst_44 = arith.constant dense<0.000000e+00> : vector<16x16xf32>
    %116 = tpu.matmul %112, %115, %cst_44 {dimension_numbers = #tpu.dot_dimension_numbers<[1], [0], [0], [1], [0, 0, 1, 1], [], []>} : vector<16x32xf32>, vector<32x16xf32>, vector<16x16xf32> -> vector<16x16xf32>
    %cst_45 = arith.constant dense<0xFF800000> : vector<16xf32>
    %117 = vector.multi_reduction <maximumf>, %116, %cst_45 [1] : vector<16x16xf32> to vector<16xf32>
    %118 = vector.shape_cast %117 : vector<16xf32> to vector<16x1xf32>
    %119 = vector.broadcast %118 : vector<16x1xf32> to vector<16x16xf32>
    %120 = arith.subf %116, %119 : vector<16x16xf32>
    %121 = math.exp %120 : vector<16x16xf32>
    %cst_46 = arith.constant dense<0.000000e+00> : vector<16xf32>
    %122 = vector.multi_reduction <add>, %121, %cst_46 [1] : vector<16x16xf32> to vector<16xf32>
    %123 = vector.shape_cast %122 : vector<16xf32> to vector<16x1xf32>
    %cst_47 = arith.constant dense<0.000000e+00> : vector<16x32xf32>
    %124 = tpu.matmul %121, %114, %cst_47 {dimension_numbers = #tpu.dot_dimension_numbers<[1], [0], [0], [1], [0, 0, 1, 1], [], []>} : vector<16x16xf32>, vector<16x32xf32>, vector<16x32xf32> -> vector<16x32xf32>
    %125 = tpu.reciprocal %123 {approx = true} : vector<16x1xf32> -> vector<16x1xf32>
    %126 = vector.broadcast %125 : vector<16x1xf32> to vector<16x32xf32>
    %127 = arith.mulf %124, %126 : vector<16x32xf32>
    %c32_48 = arith.constant 32 : index
    %c0_49 = arith.constant 0 : index
    %128 = vector.load %arg4[%c32_48, %c0_49] : memref<128x128xf32, #tpu.memory_space<vmem>>, vector<32x128xf32>
    %cst_50 = arith.constant dense<0.000000e+00> : vector<16x128xf32>
    %129 = tpu.matmul %127, %128, %cst_50 {dimension_numbers = #tpu.dot_dimension_numbers<[1], [0], [0], [1], [0, 0, 1, 1], [], []>} : vector<16x32xf32>, vector<32x128xf32>, vector<16x128xf32> -> vector<16x128xf32>
    %130 = arith.addf %109, %129 : vector<16x128xf32>
    %131 = vector.extract_strided_slice %6 {offsets = [16, 64], sizes = [16, 32], strides = [1, 1]} : vector<32x384xf32> to vector<16x32xf32>
    %cst_51 = arith.constant 0.176776692 : f32
    %132 = vector.broadcast %cst_51 : f32 to vector<16x32xf32>
    %133 = arith.mulf %131, %132 : vector<16x32xf32>
    %134 = vector.extract_strided_slice %6 {offsets = [16, 192], sizes = [16, 32], strides = [1, 1]} : vector<32x384xf32> to vector<16x32xf32>
    %135 = vector.extract_strided_slice %6 {offsets = [16, 320], sizes = [16, 32], strides = [1, 1]} : vector<32x384xf32> to vector<16x32xf32>
    %136 = tpu.transpose %134, [1, 0] : vector<16x32xf32> -> vector<32x16xf32>
    %cst_52 = arith.constant dense<0.000000e+00> : vector<16x16xf32>
    %137 = tpu.matmul %133, %136, %cst_52 {dimension_numbers = #tpu.dot_dimension_numbers<[1], [0], [0], [1], [0, 0, 1, 1], [], []>} : vector<16x32xf32>, vector<32x16xf32>, vector<16x16xf32> -> vector<16x16xf32>
    %cst_53 = arith.constant dense<0xFF800000> : vector<16xf32>
    %138 = vector.multi_reduction <maximumf>, %137, %cst_53 [1] : vector<16x16xf32> to vector<16xf32>
    %139 = vector.shape_cast %138 : vector<16xf32> to vector<16x1xf32>
    %140 = vector.broadcast %139 : vector<16x1xf32> to vector<16x16xf32>
    %141 = arith.subf %137, %140 : vector<16x16xf32>
    %142 = math.exp %141 : vector<16x16xf32>
    %cst_54 = arith.constant dense<0.000000e+00> : vector<16xf32>
    %143 = vector.multi_reduction <add>, %142, %cst_54 [1] : vector<16x16xf32> to vector<16xf32>
    %144 = vector.shape_cast %143 : vector<16xf32> to vector<16x1xf32>
    %cst_55 = arith.constant dense<0.000000e+00> : vector<16x32xf32>
    %145 = tpu.matmul %142, %135, %cst_55 {dimension_numbers = #tpu.dot_dimension_numbers<[1], [0], [0], [1], [0, 0, 1, 1], [], []>} : vector<16x16xf32>, vector<16x32xf32>, vector<16x32xf32> -> vector<16x32xf32>
    %146 = tpu.reciprocal %144 {approx = true} : vector<16x1xf32> -> vector<16x1xf32>
    %147 = vector.broadcast %146 : vector<16x1xf32> to vector<16x32xf32>
    %148 = arith.mulf %145, %147 : vector<16x32xf32>
    %c64_56 = arith.constant 64 : index
    %c0_57 = arith.constant 0 : index
    %149 = vector.load %arg4[%c64_56, %c0_57] : memref<128x128xf32, #tpu.memory_space<vmem>>, vector<32x128xf32>
    %cst_58 = arith.constant dense<0.000000e+00> : vector<16x128xf32>
    %150 = tpu.matmul %148, %149, %cst_58 {dimension_numbers = #tpu.dot_dimension_numbers<[1], [0], [0], [1], [0, 0, 1, 1], [], []>} : vector<16x32xf32>, vector<32x128xf32>, vector<16x128xf32> -> vector<16x128xf32>
    %151 = arith.addf %130, %150 : vector<16x128xf32>
    %152 = vector.extract_strided_slice %6 {offsets = [16, 96], sizes = [16, 32], strides = [1, 1]} : vector<32x384xf32> to vector<16x32xf32>
    %cst_59 = arith.constant 0.176776692 : f32
    %153 = vector.broadcast %cst_59 : f32 to vector<16x32xf32>
    %154 = arith.mulf %152, %153 : vector<16x32xf32>
    %155 = vector.extract_strided_slice %6 {offsets = [16, 224], sizes = [16, 32], strides = [1, 1]} : vector<32x384xf32> to vector<16x32xf32>
    %156 = vector.extract_strided_slice %6 {offsets = [16, 352], sizes = [16, 32], strides = [1, 1]} : vector<32x384xf32> to vector<16x32xf32>
    %157 = tpu.transpose %155, [1, 0] : vector<16x32xf32> -> vector<32x16xf32>
    %cst_60 = arith.constant dense<0.000000e+00> : vector<16x16xf32>
    %158 = tpu.matmul %154, %157, %cst_60 {dimension_numbers = #tpu.dot_dimension_numbers<[1], [0], [0], [1], [0, 0, 1, 1], [], []>} : vector<16x32xf32>, vector<32x16xf32>, vector<16x16xf32> -> vector<16x16xf32>
    %cst_61 = arith.constant dense<0xFF800000> : vector<16xf32>
    %159 = vector.multi_reduction <maximumf>, %158, %cst_61 [1] : vector<16x16xf32> to vector<16xf32>
    %160 = vector.shape_cast %159 : vector<16xf32> to vector<16x1xf32>
    %161 = vector.broadcast %160 : vector<16x1xf32> to vector<16x16xf32>
    %162 = arith.subf %158, %161 : vector<16x16xf32>
    %163 = math.exp %162 : vector<16x16xf32>
    %cst_62 = arith.constant dense<0.000000e+00> : vector<16xf32>
    %164 = vector.multi_reduction <add>, %163, %cst_62 [1] : vector<16x16xf32> to vector<16xf32>
    %165 = vector.shape_cast %164 : vector<16xf32> to vector<16x1xf32>
    %cst_63 = arith.constant dense<0.000000e+00> : vector<16x32xf32>
    %166 = tpu.matmul %163, %156, %cst_63 {dimension_numbers = #tpu.dot_dimension_numbers<[1], [0], [0], [1], [0, 0, 1, 1], [], []>} : vector<16x16xf32>, vector<16x32xf32>, vector<16x32xf32> -> vector<16x32xf32>
    %167 = tpu.reciprocal %165 {approx = true} : vector<16x1xf32> -> vector<16x1xf32>
    %168 = vector.broadcast %167 : vector<16x1xf32> to vector<16x32xf32>
    %169 = arith.mulf %166, %168 : vector<16x32xf32>
    %c96_64 = arith.constant 96 : index
    %c0_65 = arith.constant 0 : index
    %170 = vector.load %arg4[%c96_64, %c0_65] : memref<128x128xf32, #tpu.memory_space<vmem>>, vector<32x128xf32>
    %cst_66 = arith.constant dense<0.000000e+00> : vector<16x128xf32>
    %171 = tpu.matmul %169, %170, %cst_66 {dimension_numbers = #tpu.dot_dimension_numbers<[1], [0], [0], [1], [0, 0, 1, 1], [], []>} : vector<16x32xf32>, vector<32x128xf32>, vector<16x128xf32> -> vector<16x128xf32>
    %172 = arith.addf %151, %171 : vector<16x128xf32>
    %173 = tpu.concatenate %89, %172 in 0 : vector<16x128xf32>, vector<16x128xf32> -> vector<32x128xf32>
    %c0_67 = arith.constant 0 : index
    %c0_68 = arith.constant 0 : index
    %174 = vector.load %arg5[%c0_67, %c0_68] : memref<1x128xf32, #tpu.memory_space<vmem>>, vector<1x128xf32>
    %175 = vector.broadcast %174 : vector<1x128xf32> to vector<32x128xf32>
    %176 = arith.addf %173, %175 : vector<32x128xf32>
    %177 = arith.addf %1, %176 : vector<32x128xf32>
    %cst_69 = arith.constant dense<0.000000e+00> : vector<32xf32>
    %178 = vector.multi_reduction <add>, %177, %cst_69 [1] : vector<32x128xf32> to vector<32xf32>
    %179 = vector.shape_cast %178 : vector<32xf32> to vector<32x1xf32>
    %cst_70 = arith.constant 1.280000e+02 : f32
    %180 = vector.broadcast %cst_70 : f32 to vector<32x1xf32>
    %181 = arith.divf %179, %180 : vector<32x1xf32>
    %182 = vector.broadcast %181 : vector<32x1xf32> to vector<32x128xf32>
    %183 = arith.subf %177, %182 : vector<32x128xf32>
    %184 = arith.mulf %183, %183 : vector<32x128xf32>
    %cst_71 = arith.constant dense<0.000000e+00> : vector<32xf32>
    %185 = vector.multi_reduction <add>, %184, %cst_71 [1] : vector<32x128xf32> to vector<32xf32>
    %186 = vector.shape_cast %185 : vector<32xf32> to vector<32x1xf32>
    %cst_72 = arith.constant 1.280000e+02 : f32
    %187 = vector.broadcast %cst_72 : f32 to vector<32x1xf32>
    %188 = arith.divf %186, %187 : vector<32x1xf32>
    %189 = vector.broadcast %181 : vector<32x1xf32> to vector<32x128xf32>
    %190 = arith.subf %177, %189 : vector<32x128xf32>
    %cst_73 = arith.constant 9.99999974E-6 : f32
    %191 = vector.broadcast %cst_73 : f32 to vector<32x1xf32>
    %192 = arith.addf %188, %191 : vector<32x1xf32>
    %193 = math.rsqrt %192 : vector<32x1xf32>
    %194 = vector.broadcast %193 : vector<32x1xf32> to vector<32x128xf32>
    %195 = arith.mulf %190, %194 : vector<32x128xf32>
    %c0_74 = arith.constant 0 : index
    %c0_75 = arith.constant 0 : index
    %196 = vector.load %arg10[%c0_74, %c0_75] : memref<1x128xf32, #tpu.memory_space<vmem>>, vector<1x128xf32>
    %197 = vector.broadcast %196 : vector<1x128xf32> to vector<32x128xf32>
    %198 = arith.mulf %195, %197 : vector<32x128xf32>
    %c0_76 = arith.constant 0 : index
    %c0_77 = arith.constant 0 : index
    %199 = vector.load %arg11[%c0_76, %c0_77] : memref<1x128xf32, #tpu.memory_space<vmem>>, vector<1x128xf32>
    %200 = vector.broadcast %199 : vector<1x128xf32> to vector<32x128xf32>
    %201 = arith.addf %198, %200 : vector<32x128xf32>
    %c0_78 = arith.constant 0 : index
    %c0_79 = arith.constant 0 : index
    %202 = vector.load %arg6[%c0_78, %c0_79] : memref<128x512xf32, #tpu.memory_space<vmem>>, vector<128x256xf32>
    %cst_80 = arith.constant dense<0.000000e+00> : vector<32x256xf32>
    %203 = tpu.matmul %201, %202, %cst_80 {dimension_numbers = #tpu.dot_dimension_numbers<[1], [0], [0], [1], [0, 0, 1, 1], [], []>} : vector<32x128xf32>, vector<128x256xf32>, vector<32x256xf32> -> vector<32x256xf32>
    %c0_81 = arith.constant 0 : index
    %c0_82 = arith.constant 0 : index
    %204 = vector.load %arg7[%c0_81, %c0_82] : memref<1x512xf32, #tpu.memory_space<vmem>>, vector<1x256xf32>
    %205 = vector.broadcast %204 : vector<1x256xf32> to vector<32x256xf32>
    %206 = arith.addf %203, %205 : vector<32x256xf32>
    %cst_83 = arith.constant 0.000000e+00 : f32
    %207 = vector.broadcast %cst_83 : f32 to vector<32x256xf32>
    %208 = arith.maximumf %206, %207 : vector<32x256xf32>
    %c0_84 = arith.constant 0 : index
    %c0_85 = arith.constant 0 : index
    %209 = vector.load %arg8[%c0_84, %c0_85] : memref<512x128xf32, #tpu.memory_space<vmem>>, vector<256x128xf32>
    %cst_86 = arith.constant dense<0.000000e+00> : vector<32x128xf32>
    %210 = tpu.matmul %208, %209, %cst_86 {dimension_numbers = #tpu.dot_dimension_numbers<[1], [0], [0], [1], [0, 0, 1, 1], [], []>} : vector<32x256xf32>, vector<256x128xf32>, vector<32x128xf32> -> vector<32x128xf32>
    %c0_87 = arith.constant 0 : index
    %c256 = arith.constant 256 : index
    %211 = vector.load %arg6[%c0_87, %c256] : memref<128x512xf32, #tpu.memory_space<vmem>>, vector<128x256xf32>
    %cst_88 = arith.constant dense<0.000000e+00> : vector<32x256xf32>
    %212 = tpu.matmul %201, %211, %cst_88 {dimension_numbers = #tpu.dot_dimension_numbers<[1], [0], [0], [1], [0, 0, 1, 1], [], []>} : vector<32x128xf32>, vector<128x256xf32>, vector<32x256xf32> -> vector<32x256xf32>
    %c0_89 = arith.constant 0 : index
    %c256_90 = arith.constant 256 : index
    %213 = vector.load %arg7[%c0_89, %c256_90] : memref<1x512xf32, #tpu.memory_space<vmem>>, vector<1x256xf32>
    %214 = vector.broadcast %213 : vector<1x256xf32> to vector<32x256xf32>
    %215 = arith.addf %212, %214 : vector<32x256xf32>
    %cst_91 = arith.constant 0.000000e+00 : f32
    %216 = vector.broadcast %cst_91 : f32 to vector<32x256xf32>
    %217 = arith.maximumf %215, %216 : vector<32x256xf32>
    %c256_92 = arith.constant 256 : index
    %c0_93 = arith.constant 0 : index
    %218 = vector.load %arg8[%c256_92, %c0_93] : memref<512x128xf32, #tpu.memory_space<vmem>>, vector<256x128xf32>
    %cst_94 = arith.constant dense<0.000000e+00> : vector<32x128xf32>
    %219 = tpu.matmul %217, %218, %cst_94 {dimension_numbers = #tpu.dot_dimension_numbers<[1], [0], [0], [1], [0, 0, 1, 1], [], []>} : vector<32x256xf32>, vector<256x128xf32>, vector<32x128xf32> -> vector<32x128xf32>
    %220 = arith.addf %210, %219 : vector<32x128xf32>
    %c0_95 = arith.constant 0 : index
    %c0_96 = arith.constant 0 : index
    %221 = vector.load %arg9[%c0_95, %c0_96] : memref<1x128xf32, #tpu.memory_space<vmem>>, vector<1x128xf32>
    %222 = vector.broadcast %221 : vector<1x128xf32> to vector<32x128xf32>
    %223 = arith.addf %220, %222 : vector<32x128xf32>
    %224 = arith.addf %201, %223 : vector<32x128xf32>
    %cst_97 = arith.constant dense<0.000000e+00> : vector<32xf32>
    %225 = vector.multi_reduction <add>, %224, %cst_97 [1] : vector<32x128xf32> to vector<32xf32>
    %226 = vector.shape_cast %225 : vector<32xf32> to vector<32x1xf32>
    %cst_98 = arith.constant 1.280000e+02 : f32
    %227 = vector.broadcast %cst_98 : f32 to vector<32x1xf32>
    %228 = arith.divf %226, %227 : vector<32x1xf32>
    %229 = vector.broadcast %228 : vector<32x1xf32> to vector<32x128xf32>
    %230 = arith.subf %224, %229 : vector<32x128xf32>
    %231 = arith.mulf %230, %230 : vector<32x128xf32>
    %cst_99 = arith.constant dense<0.000000e+00> : vector<32xf32>
    %232 = vector.multi_reduction <add>, %231, %cst_99 [1] : vector<32x128xf32> to vector<32xf32>
    %233 = vector.shape_cast %232 : vector<32xf32> to vector<32x1xf32>
    %cst_100 = arith.constant 1.280000e+02 : f32
    %234 = vector.broadcast %cst_100 : f32 to vector<32x1xf32>
    %235 = arith.divf %233, %234 : vector<32x1xf32>
    %236 = vector.broadcast %228 : vector<32x1xf32> to vector<32x128xf32>
    %237 = arith.subf %224, %236 : vector<32x128xf32>
    %cst_101 = arith.constant 9.99999974E-6 : f32
    %238 = vector.broadcast %cst_101 : f32 to vector<32x1xf32>
    %239 = arith.addf %235, %238 : vector<32x1xf32>
    %240 = math.rsqrt %239 : vector<32x1xf32>
    %241 = vector.broadcast %240 : vector<32x1xf32> to vector<32x128xf32>
    %242 = arith.mulf %237, %241 : vector<32x128xf32>
    %c0_102 = arith.constant 0 : index
    %c0_103 = arith.constant 0 : index
    %243 = vector.load %arg12[%c0_102, %c0_103] : memref<1x128xf32, #tpu.memory_space<vmem>>, vector<1x128xf32>
    %244 = vector.broadcast %243 : vector<1x128xf32> to vector<32x128xf32>
    %245 = arith.mulf %242, %244 : vector<32x128xf32>
    %c0_104 = arith.constant 0 : index
    %c0_105 = arith.constant 0 : index
    %246 = vector.load %arg13[%c0_104, %c0_105] : memref<1x128xf32, #tpu.memory_space<vmem>>, vector<1x128xf32>
    %247 = vector.broadcast %246 : vector<1x128xf32> to vector<32x128xf32>
    %248 = arith.addf %245, %247 : vector<32x128xf32>
    %249 = vector.shape_cast %248 : vector<32x128xf32> to vector<2x16x128xf32>
    %c0_106 = arith.constant 0 : index
    %c0_107 = arith.constant 0 : index
    %c0_108 = arith.constant 0 : index
    %250 = vector.load %arg14[%c0_106, %c0_107, %c0_108] : memref<2x16x128xf32, #tpu.memory_space<vmem>>, vector<2x16x128xf32>
    tpu.vector_store %arg14[%c0_106, %c0_107, %c0_108], %249 {strides = array<i32>} : memref<2x16x128xf32, #tpu.memory_space<vmem>>, vector<2x16x128xf32>,
    return
  }
  func.func @transform_0(%arg0: i32) -> (i32, i32, i32) {
    %c0_i32 = arith.constant 0 : i32
    %c0_i32_0 = arith.constant 0 : i32
    %c0_i32_1 = arith.constant 0 : i32
    return %arg0, %c0_i32, %c0_i32_0 : i32, i32, i32
  }
  func.func @transform_1(%arg0: i32) -> (i32, i32) {
    %c0_i32 = arith.constant 0 : i32
    %c0_i32_0 = arith.constant 0 : i32
    %c0_i32_1 = arith.constant 0 : i32
    return %c0_i32, %c0_i32_0 : i32, i32
  }
  func.func @transform_2(%arg0: i32) -> (i32, i32) {
    %c0_i32 = arith.constant 0 : i32
    %c0_i32_0 = arith.constant 0 : i32
    %c0_i32_1 = arith.constant 0 : i32
    return %c0_i32, %c0_i32_0 : i32, i32
  }
  func.func @transform_3(%arg0: i32) -> (i32, i32) {
    %c0_i32 = arith.constant 0 : i32
    %c0_i32_0 = arith.constant 0 : i32
    %c0_i32_1 = arith.constant 0 : i32
    return %c0_i32, %c0_i32_0 : i32, i32
  }
  func.func @transform_4(%arg0: i32) -> (i32, i32) {
    %c0_i32 = arith.constant 0 : i32
    %c0_i32_0 = arith.constant 0 : i32
    %c0_i32_1 = arith.constant 0 : i32
    return %c0_i32, %c0_i32_0 : i32, i32
  }
  func.func @transform_5(%arg0: i32) -> (i32, i32) {
    %c0_i32 = arith.constant 0 : i32
    %c0_i32_0 = arith.constant 0 : i32
    %c0_i32_1 = arith.constant 0 : i32
    return %c0_i32, %c0_i32_0 : i32, i32
  }
  func.func @transform_6(%arg0: i32) -> (i32, i32) {
    %c0_i32 = arith.constant 0 : i32
    %c0_i32_0 = arith.constant 0 : i32
    %c0_i32_1 = arith.constant 0 : i32
    return %c0_i32, %c0_i32_0 : i32, i32
  }
  func.func @transform_7(%arg0: i32) -> (i32, i32) {
    %c0_i32 = arith.constant 0 : i32
    %c0_i32_0 = arith.constant 0 : i32
    %c0_i32_1 = arith.constant 0 : i32
    return %c0_i32, %c0_i32_0 : i32, i32
  }
  func.func @transform_8(%arg0: i32) -> (i32, i32) {
    %c0_i32 = arith.constant 0 : i32
    %c0_i32_0 = arith.constant 0 : i32
    %c0_i32_1 = arith.constant 0 : i32
    return %c0_i32, %c0_i32_0 : i32, i32
  }
  func.func @transform_9(%arg0: i32) -> (i32, i32) {
    %c0_i32 = arith.constant 0 : i32
    %c0_i32_0 = arith.constant 0 : i32
    %c0_i32_1 = arith.constant 0 : i32
    return %c0_i32, %c0_i32_0 : i32, i32
  }
  func.func @transform_10(%arg0: i32) -> (i32, i32) {
    %c0_i32 = arith.constant 0 : i32
    %c0_i32_0 = arith.constant 0 : i32
    %c0_i32_1 = arith.constant 0 : i32
    return %c0_i32, %c0_i32_0 : i32, i32
  }
  func.func @transform_11(%arg0: i32) -> (i32, i32) {
    %c0_i32 = arith.constant 0 : i32
    %c0_i32_0 = arith.constant 0 : i32
    %c0_i32_1 = arith.constant 0 : i32
    return %c0_i32, %c0_i32_0 : i32, i32
  }
  func.func @transform_12(%arg0: i32) -> (i32, i32) {
    %c0_i32 = arith.constant 0 : i32
    %c0_i32_0 = arith.constant 0 : i32
    %c0_i32_1 = arith.constant 0 : i32
    return %c0_i32, %c0_i32_0 : i32, i32
  }
  func.func @transform_13(%arg0: i32) -> (i32, i32, i32) {
    %c0_i32 = arith.constant 0 : i32
    %c0_i32_0 = arith.constant 0 : i32
    %c0_i32_1 = arith.constant 0 : i32
    return %arg0, %c0_i32, %c0_i32_0 : i32, i32, i32
  }
}

</mosaic_0001>

<bundles_post_ra>
// kernel: tpu_custom_call.1
= control target key start
LH: loop header
LB: loop body
LE: loop exit
PB: predicated region body
PF: predicated region fallthrough
CT: control target
= control target key end

     0   :  { %s6054_s0 = inlined_call_operand.hbm [shape: f32[4,16,128], index: 0, kind: input, shape index: {}]   ;;  %s6055_s1 = inlined_call_operand.hbm [shape: f32[128,384], index: 1, kind: input, shape index: {}]   ;;  %s6056_s2 = inlined_call_operand.vmem [shape: f32[1,384], index: 2, kind: input, shape index: {}]   ;;  %s6057_s3 = inlined_call_operand.hbm [shape: f32[128,128], index: 3, kind: input, shape index: {}]   ;;  %s6058_s4 = inlined_call_operand.vmem [shape: f32[1,128], index: 4, kind: input, shape index: {}]   ;;  %s6059_s5 = inlined_call_operand.hbm [shape: f32[128,512], index: 5, kind: input, shape index: {}]   ;;  %s6060_s6 = inlined_call_operand.vmem [shape: f32[1,512], index: 6, kind: input, shape index: {}]   ;;  %s6061_s7 = inlined_call_operand.hbm [shape: f32[512,128], index: 7, kind: input, shape index: {}]   ;;  %s6062_s8 = inlined_call_operand.vmem [shape: f32[1,128], index: 8, kind: input, shape index: {}]   ;;  %s6063_s9 = inlined_call_operand.vmem [shape: f32[1,128], index: 9, kind: input, shape index: {}]   ;;  %s6064_s10 = inlined_call_operand.vmem [shape: f32[1,128], index: 10, kind: input, shape index: {}]   ;;  %s6065_s11 = inlined_call_operand.vmem [shape: f32[1,128], index: 11, kind: input, shape index: {}]   ;;  %s6066_s12 = inlined_call_operand.vmem [shape: f32[1,128], index: 12, kind: input, shape index: {}]   ;;  %s6067_s13 = inlined_call_operand.hbm [shape: f32[4,16,128], index: 13, kind: output, shape index: {}]  }
   0x1   :  { %6074 = sst [smem:[#allocation18_spill]] %s6055_s1 }
   0x2   :  { %6075 = sst [smem:[#allocation19_spill]] %s6062_s8 }
   0x3   :  { %6076 = sst [smem:[#allocation20_spill]] %s6065_s11 }
   0x4   :  { %6077 = sst [smem:[#allocation21_spill]] %s6066_s12 }
   0x5   :  { %6078 = sst [smem:[#allocation22_spill]] %s6067_s13 }
   0x6   :  { %18 = vsyncpa [#allocation3], 0 }
   0x7   :  { %20 = vsyncpa [#allocation3 + $0x1], 0 }
   0x8   :  { %21 = vsyncpa [#allocation6], 0 }
   0x9   :  { %22 = vsyncpa [#allocation9], 0 }
   0xa   :  { %23 = vsyncpa [#allocation4], 0 }
   0xb   :  { %25 = vsyncpa [#allocation4 + $0x1], 0  ;;  %s5286_s25 = smov 0   ;;  %s5288_s26 = smov 0  }
   0xc   :  { %s5290_s27 = smov 0   ;;  %s5292_s28 = smov 0  }
   0xd LB: > { %6079 = sst [smem:[#allocation16_spill]] %s5184_s25  ;;  %s5307_s29 = sadd.s32 4294967295, %s5196_s28   ;;  %s5196_s28 = sphi %s5292_s28, %s6109_s28   ;;  %s5192_s27 = sphi %s5290_s27, %s6108_s27   ;;  %s5188_s26 = sphi %s5288_s26, %s6107_s26   ;;  %s5184_s25 = sphi %s5286_s25, %s6106_s25  }
   0xe   : > { %s3834_s30 = sadd.s32 4294967294, %s5196_s28   ;;  %p51_p0 = scmp.ne.s32.totalorder %s5188_s26, %s5184_s25 }
   0xf   : > { %p6070_p1 = scmp.eq.s32.totalorder %s5307_s29, 0  ;;  %p333_p3 = scmp.eq.s32.totalorder %s3834_s30, 1 }
  0x10   : > { %p3835_p5 = scmp.ge.s32.totalorder %s5196_s28, 1  ;;  %p340_p7 = scmp.lt.s32.totalorder %s5196_s28, 3 }
  0x11   : > { %p5316_p4 = por %p6070_p1, %p51_p0  ;;  %p5321_p6 = por %p333_p3, %p51_p0 }
  0x12   : > { %p5326_p8 = pnand %p3835_p5, %p340_p7  ;;  %s5198_s17 = smov [#allocation5]  }
  0x13   : > { %s6080_s14 = scalar_select %p5316_p4, 1, 0 }
  0x14   : > { %s6081_s15 = scalar_select %p5321_p6, 1, 0 }
  0x15   : > { %s6083_s16 = scalar_select %p5326_p8, 1, 0 }
  0x16   : > { %6082 = sst [smem:[#allocation17_spill]] %s6081_s15  ;;  %s352_s18 = sshll.u32 %s5198_s17, 4  ;;  %s5330_s18 = int_to_ptr.vmem [resolvable:$true] %s352_s18 }
  0x17   : > { %p4758_p9 = pneg %p5326_p8  ;;  %s5199_s20 = smov [#allocation8]  }
  0x18   : > { %s384_s21 = sshll.u32 %s5199_s20, 4  ;;  %s6085_s1 = sld [smem:[#allocation18_spill]]  ;;  %s5341_s21 = int_to_ptr.vmem [resolvable:$true] %s384_s21 }
  0x19   : > { %p5337_p11 = pnand %p4758_p9, %p6070_p1 }
  0x1b   : > { %p5351_p13 = pneg %p5337_p11 }
  0x1e   : > { %s4980_s24 = scalar_lea.hbm %s6085_s1, 6144 }
  0x1f   : > { %p4981_p12 = scmp.ne.s32.totalorder %s6085_s1, %s4980_s24  ;;  %p4987_p5 = scmp.lt.u32.totalorder %s4980_s24, %s6085_s1 }
  0x21   : > { %p4983_p0 = pnand %p5351_p13, %p4981_p12 }
  0x23   : > { %p4984_p3 = pneg %p4983_p0 }
  0x25   : > { %p4989_p7 = pnand %p4987_p5, %p4984_p3 }
  0x27   : > { %4992 = shalt.err (!%p4989_p7)
}
  0x28   : > { %s4993_s22 = scalar_lea.vmem %s5330_s18, 6144  ;;  %p5001_p2 = scmp.lt.s32.totalorder %s5330_s18, %s5330_s18 }
  0x29   : > { %p4994_p9 = scmp.ne.s32.totalorder %s5330_s18, %s4993_s22  ;;  %p5002_p6 = scmp.lt.s32.totalorder %s4993_s22, %s4993_s22 }
  0x2b   : > { %p4996_p10 = pnand %p4994_p9, %p5351_p13  ;;  %p5003_p12 = por %p5002_p6, %p5001_p2 }
  0x2d   : > { %p4997_p1 = pneg %p4996_p10 }
  0x2f   : > { %p5004_p0 = pnand %p5003_p12, %p4997_p1 }
  0x31   : > { %5007 = shalt.err (!%p5004_p0)
}
  0x32   : > { %s5200_s23 = smov 384   ;;  %s5201_s25 = smov 24  }
  0x33   : > { %4761 = dma.hbm_to_vmem [thread:$0]  (!%p5337_p11), %s6085_s1, 6144, %s5330_s18, [#allocation6], %s5200_s23, %s5200_s23, %s5201_s25  }
  0x34   : > { %s5008_s13 = scalar_lea.hbm %s6059_s5, 8192 }
  0x35   : > { %p5009_p2 = scmp.ne.s32.totalorder %s6059_s5, %s5008_s13  ;;  %p5015_p10 = scmp.lt.u32.totalorder %s5008_s13, %s6059_s5 }
  0x37   : > { %p5011_p1 = pnand %p5009_p2, %p5351_p13 }
  0x39   : > { %p5012_p6 = pneg %p5011_p1 }
  0x3b   : > { %p5017_p3 = pnand %p5015_p10, %p5012_p6 }
  0x3d   : > { %5020 = shalt.err (!%p5017_p3)
}
  0x3e   : > { %s5021_s18 = scalar_lea.vmem %s5341_s21, 8192  ;;  %p5029_p12 = scmp.lt.s32.totalorder %s5341_s21, %s5341_s21 }
  0x3f   : > { %p5022_p5 = scmp.ne.s32.totalorder %s5341_s21, %s5021_s18  ;;  %p5030_p0 = scmp.lt.s32.totalorder %s5021_s18, %s5021_s18 }
  0x41   : > { %p5024_p7 = pnand %p5022_p5, %p5351_p13  ;;  %p5031_p2 = por %p5030_p0, %p5029_p12 }
  0x43   : > { %p5025_p9 = pneg %p5024_p7 }
  0x45   : > { %p5032_p1 = pnand %p5031_p2, %p5025_p9 }
  0x47   : > { %5035 = shalt.err (!%p5032_p1)
}
  0x48   : > { %s5202_s11 = smov 512   ;;  %s5203_s8 = smov 32  }
  0x49   : > { %4767 = dma.hbm_to_vmem [thread:$0]  (!%p5337_p11), %s6059_s5, 8192, %s5341_s21, [#allocation9], %s5202_s11, %s5202_s11, %s5203_s8  }
  0x4a   : > { %s5204_s23 = smov [#allocation7]   ;;  %s5036_s17 = scalar_lea.hbm %s6057_s3, 2048 }
  0x4b   : > { %s368_s25 = sshll.u32 %s5204_s23, 4  ;;  %p5037_p6 = scmp.ne.s32.totalorder %s6057_s3, %s5036_s17  ;;  %s369_s25 = int_to_ptr.vmem [resolvable:$true] %s368_s25 }
  0x4c   : > { %p5043_p5 = scmp.lt.u32.totalorder %s5036_s17, %s6057_s3 }
  0x4d   : > { %p5039_p10 = pnand %p5037_p6, %p5351_p13 }
  0x4f   : > { %p5040_p3 = pneg %p5039_p10 }
  0x51   : > { %p5045_p7 = pnand %p5043_p5, %p5040_p3 }
  0x53   : > { %5048 = shalt.err (!%p5045_p7)
}
  0x54   : > { %s5049_s21 = scalar_lea.vmem %s369_s25, 2048  ;;  %p5057_p2 = scmp.lt.s32.totalorder %s369_s25, %s369_s25 }
  0x55   : > { %p5050_p9 = scmp.ne.s32.totalorder %s369_s25, %s5049_s21  ;;  %p5058_p1 = scmp.lt.s32.totalorder %s5049_s21, %s5049_s21 }
  0x57   : > { %p5052_p12 = pnand %p5050_p9, %p5351_p13  ;;  %p5059_p4 = por %p5058_p1, %p5057_p2 }
  0x59   : > { %p5053_p0 = pneg %p5052_p12 }
  0x5b   : > { %p5060_p8 = pnand %p5059_p4, %p5053_p0 }
  0x5d   : > { %5063 = shalt.err (!%p5060_p8)
}
  0x5e   : > { %s5205_s11 = smov 128   ;;  %s5206_s8 = smov 8  }
  0x5f   : > { %4764 = dma.hbm_to_vmem [thread:$0]  (!%p5337_p11), %s6057_s3, 2048, %s369_s25, [#allocation6], %s5205_s11, %s5205_s11, %s5206_s8  }
  0x60   : > { %s5207_s13 = smov [#allocation10]   ;;  %s5064_s17 = scalar_lea.hbm %s6061_s7, 8192 }
  0x61   : > { %s400_s23 = sshll.u32 %s5207_s13, 4  ;;  %p5065_p4 = scmp.ne.s32.totalorder %s6061_s7, %s5064_s17  ;;  %s401_s23 = int_to_ptr.vmem [resolvable:$true] %s400_s23 }
  0x62   : > { %p5071_p10 = scmp.lt.u32.totalorder %s5064_s17, %s6061_s7 }
  0x63   : > { %p5067_p8 = pnand %p5065_p4, %p5351_p13 }
  0x65   : > { %p5068_p6 = pneg %p5067_p8 }
  0x67   : > { %p5073_p3 = pnand %p5071_p10, %p5068_p6 }
  0x69   : > { %5076 = shalt.err (!%p5073_p3)
}
  0x6a   : > { %s5077_s25 = scalar_lea.vmem %s401_s23, 8192  ;;  %p5085_p12 = scmp.lt.s32.totalorder %s401_s23, %s401_s23 }
  0x6b   : > { %p5078_p5 = scmp.ne.s32.totalorder %s401_s23, %s5077_s25  ;;  %p5086_p0 = scmp.lt.s32.totalorder %s5077_s25, %s5077_s25 }
  0x6d   : > { %p5080_p7 = pnand %p5078_p5, %p5351_p13  ;;  %p5087_p2 = por %p5086_p0, %p5085_p12 }
  0x6f   : > { %p5081_p9 = pneg %p5080_p7 }
  0x71   : > { %p5088_p1 = pnand %p5087_p2, %p5081_p9 }
  0x73   : > { %5091 = shalt.err (!%p5088_p1)
}
  0x74   : > { %4770 = dma.hbm_to_vmem [thread:$0]  (!%p5337_p11), %s6061_s7, 8192, %s401_s23, [#allocation9], %s5205_s11, %s5205_s11, %s5206_s8  }
  0x75   : > { %s5438_s15 = sadd.s32 1, %s5196_s28   ;;  %s38_s19 = sadd.s32 1, %s5192_s27 }
  0x76   : > { %s35_s13 = ssub.s32 %s5196_s28, %s5438_s15  ;;  %p45_p13 = scmp.ne.s32.totalorder %s5192_s27, %s5188_s26 }
  0x77   : > { %p36_p4 = scmp.eq.s32.totalorder %s35_s13, 0  ;;  %p46_p8 = scmp.eq.s32.totalorder %s5196_s28, 0 }
  0x78   : > { %p6087_p6 = scmp.eq.s32.totalorder %s5307_s29, 1  ;;  %p4783_p3 = scmp.lt.s32.totalorder %s5196_s28, 2 }
  0x79   : > { %s5454_s30 = scalar_select %p36_p4, %s5192_s27, %s38_s19  }
  0x7a   : > { %p5448_p10 = por %p6087_p6, %p45_p13  ;;  %p47_p5 = por %p46_p8, %p45_p13 }
  0x7b   : > { %s429_s17 = sand.u32 1, %s5192_s27   ;;  %s3929_s23 = sshll.u32 %s5196_s28, 9 }
  0x7c   : > { %s3841_s20 = sshll.u32 %s429_s17, 5  ;;  %s5461_s21 = scalar_lea.hbm %s6054_s0, %s3929_s23 }
  0x7d   : > { %s433_s25 = scalar_lea.vmem [#allocation2], %s3841_s20  ;;  %p5465_p11 = pnand %p4783_p3, %p47_p5 }
  0x7e   : > { %s441_s1 = sshll.u32 %s433_s25, 4  ;;  %s5469_s19 = scalar_lea.sflag [#allocation3], %s429_s17  ;;  %s5463_s1 = int_to_ptr.vmem [resolvable:$true] %s441_s1 }
  0x7f   : > { %s5092_s13 = scalar_lea.hbm %s5461_s21, 512  ;;  %p5094_p9 = pneg %p5465_p11 }
  0x80   : > { %p5093_p7 = scmp.ne.s32.totalorder %s5461_s21, %s5092_s13  ;;  %s5097_s22 = scalar_lea.hbm %s6054_s0, 1024 }
  0x81   : > { %p5098_p2 = scmp.lt.u32.totalorder %s5461_s21, %s6054_s0  ;;  %p5099_p1 = scmp.lt.u32.totalorder %s5097_s22, %s5092_s13 }
  0x82   : > { %p5095_p12 = pnand %p5094_p9, %p5093_p7  ;;  %p5101_p4 = scmp.lt.u32.totalorder %s5092_s13, %s5461_s21 }
  0x83   : > { %p5100_p13 = por %p5099_p1, %p5098_p2 }
  0x84   : > { %p5096_p0 = pneg %p5095_p12 }
  0x85   : > { %p5102_p8 = por %p5101_p4, %p5100_p13 }
  0x87   : > { %p5103_p6 = pnand %p5102_p8, %p5096_p0 }
  0x89   : > { %5106 = shalt.err (!%p5103_p6)
}
  0x8a   : > { %s5107_s17 = scalar_lea.vmem %s5463_s1, 512  ;;  %s5208_s20 = smov [#allocation2]  }
  0x8b   : > { %p5108_p3 = scmp.ne.s32.totalorder %s5463_s1, %s5107_s17  ;;  %s5112_s23 = sshll.u32 %s5208_s20, 4  ;;  %s5113_s23 = int_to_ptr.vmem [resolvable:$false] %s5112_s23 }
  0x8c   : > { %s5114_s18 = scalar_lea.vmem %s5113_s23, 1024  ;;  %p5115_p12 = scmp.lt.s32.totalorder %s5463_s1, %s5113_s23 }
  0x8d   : > { %p5110_p5 = pnand %p5108_p3, %p5094_p9  ;;  %p5116_p2 = scmp.lt.s32.totalorder %s5114_s18, %s5107_s17 }
  0x8f   : > { %p5111_p7 = pneg %p5110_p5  ;;  %p5117_p1 = por %p5116_p2, %p5115_p12 }
  0x91   : > { %p5118_p13 = pnand %p5117_p1, %p5111_p7 }
  0x93   : > { %5121 = shalt.err (!%p5118_p13)
}
  0x94   : > { %4774 = dma.hbm_to_vmem [thread:$0]  (!%p5465_p11), %s5461_s21, 512, %s5463_s1, %s5469_s19, %s5205_s11, %s5205_s11, %s5206_s8  }
  0x95   : > { %p6090_p9 = scmp.ne.s32.totalorder %s6083_s16, 0 }
  0x96   : > { %s5503_s13 = sand.u32 (!%p6090_p9), 1, %s5188_s26   ;;  %p6091_p0 = scmp.ne.s32.totalorder (!%p6090_p9), %s6080_s14, 0 }
  0x97   : > { %453 = sbr.rel (%p6090_p9) target bundleno = 4350 (0x10fe), region = 72  ;;  %s3846_s22 = sshll.u32 (!%p6090_p9), %s5503_s13, 5 }
  0x98   : > { %s456_s25 = scalar_lea.sflag (!%p6090_p9), [#allocation3], %s5503_s13  ;;  %s5509_s12 = scalar_lea.vmem (!%p6090_p9), [#allocation2], %s3846_s22 }
  0x9e   : > { %5167 = dma.done.wait (%p6091_p0), %s456_s25, 512  }
  0x9f   : > { %5169 = vsyncadd (%p6091_p0), %s456_s25, 4294966784  ;;  %p6092_p11 = scmp.eq.s32.totalorder %s5307_s29, 0 }
  0xa1   : > { %5171 = dma.done.wait (%p6092_p11), [#allocation6], 8192   ;;  %p6093_p4 = pmov %p6092_p11 }
  0xa3   : > { %5173 = vsyncadd (%p6093_p4), [#allocation6], 4294959104  ;;  %p6094_p8 = pmov %p6093_p4 }
  0xa4   : > { %p6095_p6 = pmov %p6093_p4 }
  0xa5   : > { %5175 = dma.done.wait (%p6094_p8), [#allocation9], 16384  }
  0xa6   : > { %5177 = vsyncadd (%p6095_p6), [#allocation9], 4294950912  ;;  %v5209_v0 = vmov 0.0   ;;  %v525_v1 = vld [vmem:[#allocation5 + $0x8] sm:$0xff]  ;;  %v528_v2 = vld [vmem:[#allocation5 + $0x20] sm:$0xff]  ;;  %vm765_vm0 = vcmask 261120  }
  0xa7   : > { %653 = vmatprep.mubr.f32.mxu0 %v5209_v0  ;;  %v524_v3 = vld [vmem:[#allocation5] sm:$0xff]  ;;  %v4390_v4 = vpack.c.bf16 %v528_v2, %v525_v1  ;;  %v527_v5 = vld [vmem:[#allocation5 + $0x18] sm:$0xff]  ;;  %v534_v7 = vld [vmem:[#allocation5 + $0x50] sm:$0xff]  ;;  %s5210_s11 = smov 96   ;;  %vm853_vm2 = vcmask 130048   ;;  %s5211_s8 = smov 64  }
  0xa8   : > { %v531_v6 = vld [vmem:[#allocation5 + $0x38] sm:$0xff]  ;;  %v4392_v8 = vpack.c.bf16 %v527_v5, %v524_v3  ;;  %v530_v10 = vld [vmem:[#allocation5 + $0x30] sm:$0xff]  ;;  %v533_v11 = vld [vmem:[#allocation5 + $0x48] sm:$0xff]  ;;  %s5212_s21 = smov 32   ;;  %s6099_s17 = sld [smem:[#allocation20_spill]] }
  0xa9   : > { %v4394_v9 = vpack.c.bf16 %v534_v7, %v531_v6  ;;  %v537_v12 = vld [vmem:[#allocation5 + $0x68] sm:$0xff]  ;;  %4391 = vmatprep.subr.bf16.mxu0 %v4390_v4  ;;  %v540_v13 = vld [vmem:[#allocation5 + $0x80] sm:$0xff]  ;;  %v4396_v14 = vpack.c.bf16 %v533_v11, %v530_v10  ;;  %v539_v17 = vld [vmem:[#allocation5 + $0x78] sm:$0xff]  ;;  %s6100_s18 = sld [smem:[#allocation21_spill]]  ;;  %s517_s25 = scalar_lea.vmem [#allocation11], %s3846_s22 }
  0xaa   : > { %4393 = vmatpush1.bf16.msra.mxu0 %v4392_v8  ;;  %v4398_v15 = vpack.c.bf16 %v540_v13, %v537_v12  ;;  %v536_v16 = vld [vmem:[#allocation5 + $0x60] sm:$0xff]  ;;  %v543_v18 = vld [vmem:[#allocation5 + $0x98] sm:$0xff]  ;;  %v546_v19 = vld [vmem:[#allocation5 + $0xb0] sm:$0xff]  ;;  %s3931_s22 = sshll.u32 %s5307_s29, 9  ;;  %s5213_s29 = smov [#allocation11]  }
  0xab   : > { %4395 = vmatprep.subr.bf16.mxu0 %v4394_v9  ;;  %v4400_v20 = vpack.c.bf16 %v539_v17, %v536_v16  ;;  %v4402_v21 = vpack.c.bf16 %v546_v19, %v543_v18  ;;  %v542_v22 = vld [vmem:[#allocation5 + $0x90] sm:$0xff]  ;;  %v545_v23 = vld [vmem:[#allocation5 + $0xa8] sm:$0xff]  ;;  %v552_v25 = vld [vmem:[#allocation5 + $0xe0] sm:$0xff]  ;;  %s5126_s19 = sshll.u32 %s5213_s29, 4  ;;  %s5127_s19 = int_to_ptr.vmem [resolvable:$false] %s5126_s19 }
  0xac   : > { %v549_v24 = vld [vmem:[#allocation5 + $0xc8] sm:$0xff]  ;;  %v5525_v26 = vld [vmem:[%s5509_s12] sm:$0xff]  ;;  %v526_v27 = vld [vmem:[#allocation5 + $0x10] sm:$0xff]  ;;  %v4404_v29 = vpack.c.bf16 %v545_v23, %v542_v22 }
  0xad   : > { %v529_v28 = vld [vmem:[#allocation5 + $0x28] sm:$0xff]  ;;  %4184 = vmatprep.mubr.f32.mxu1 %v5525_v26  ;;  %v548_v30 = vld [vmem:[#allocation5 + $0xc0] sm:$0xff]  ;;  %v535_v33 = vld [vmem:[#allocation5 + $0x58] sm:$0xff]  ;;  %v4406_v34 = vpack.c.bf16 %v552_v25, %v549_v24 }
  0xae   : > { %4397 = vmatpush1.bf16.msra.mxu0 %v4396_v14  ;;  %v4422_v31 = vpack.c.bf16 %v529_v28, %v526_v27  ;;  %v532_v32 = vld [vmem:[#allocation5 + $0x40] sm:$0xff]  ;;  %v551_v35 = vld [vmem:[#allocation5 + $0xd8] sm:$0xff]  ;;  %v538_v37 = vld [vmem:[#allocation5 + $0x70] sm:$0xff]  ;;  %v574_v14 = vlaneseq }
  0xaf   : > { %4399 = vmatprep.subr.bf16.mxu0 %v4398_v15  ;;  %v4426_v36 = vpack.c.bf16 %v535_v33, %v532_v32  ;;  %v541_v38 = vld [vmem:[#allocation5 + $0x88] sm:$0xff]  ;;  %v555_v39 = vld [vmem:[#allocation5 + $0xf8] sm:$0xff]  ;;  %v558_v40 = vld [vmem:[#allocation5 + $0x110] sm:$0xff]  ;;  %v4408_v41 = vpack.c.bf16 %v551_v35, %v548_v30 }
  0xb0   : > { %4423 = vmatprep.subr.bf16.mxu1 %v4422_v31  ;;  %v554_v42 = vld [vmem:[#allocation5 + $0xf0] sm:$0xff]  ;;  %v4430_v43 = vpack.c.bf16 %v541_v38, %v538_v37  ;;  %v4410_v44 = vpack.c.bf16 %v558_v40, %v555_v39  ;;  %v557_v45 = vld [vmem:[#allocation5 + $0x108] sm:$0xff]  ;;  %v544_v46 = vld [vmem:[#allocation5 + $0xa0] sm:$0xff]  ;;  %v575_v15 = vshrl.u32 %v574_v14, 7 }
  0xb1   : > { %4425 = vmatpush3.bf16.msra.mxu1 %v4422_v31  ;;  %v547_v47 = vld [vmem:[#allocation5 + $0xb8] sm:$0xff]  ;;  %v561_v48 = vld [vmem:[#allocation5 + $0x128] sm:$0xff]  ;;  %v564_v49 = vld [vmem:[#allocation5 + $0x140] sm:$0xff]  ;;  %v4412_v50 = vpack.c.bf16 %v557_v45, %v554_v42 }
  0xb2   : > { %4401 = vmatpush1.bf16.msra.mxu0 %v4400_v20  ;;  %4427 = vmatprep.subr.bf16.mxu1 %v4426_v36  ;;  %v560_v51 = vld [vmem:[#allocation5 + $0x120] sm:$0xff]  ;;  %v4434_v52 = vpack.c.bf16 %v547_v47, %v544_v46  ;;  %v4414_v53 = vpack.c.bf16 %v564_v49, %v561_v48  ;;  %v563_v54 = vld [vmem:[#allocation5 + $0x138] sm:$0xff]  ;;  %v550_v55 = vld [vmem:[#allocation5 + $0xd0] sm:$0xff]  ;;  %v5539_v16 = vsub.s32 0, %v575_v15  ;;  %v5547_v19 = vsub.s32 1, %v575_v15 }
  0xb3   : > { %4403 = vmatprep.subr.bf16.mxu0 %v4402_v21  ;;  %v553_v56 = vld [vmem:[#allocation5 + $0xe8] sm:$0xff]  ;;  %v567_v57 = vld [vmem:[#allocation5 + $0x158] sm:$0xff]  ;;  %v570_v58 = vld [vmem:[#allocation5 + $0x170] sm:$0xff]  ;;  %v4416_v59 = vpack.c.bf16 %v563_v54, %v560_v51  ;;  %v584_v38 = vsub.s32 2, %v575_v15 }
  0xb4   : > { %v566_v60 = vld [vmem:[#allocation5 + $0x150] sm:$0xff]  ;;  %v4438_v61 = vpack.c.bf16 %v553_v56, %v550_v55  ;;  %v4418_v62 = vpack.c.bf16 %v570_v58, %v567_v57  ;;  %v569_v63 = vld [vmem:[#allocation5 + $0x168] sm:$0xff]  ;;  %v556_v1 = vld [vmem:[#allocation5 + $0x100] sm:$0xff] }
  0xb5   : > { %4429 = vmatpush3.bf16.msra.mxu1 %v4426_v36  ;;  %v559_v2 = vld [vmem:[#allocation5 + $0x118] sm:$0xff]  ;;  %v4420_v3 = vpack.c.bf16 %v569_v63, %v566_v60  ;;  %v562_v5 = vld [vmem:[#allocation5 + $0x130] sm:$0xff]  ;;  %v565_v6 = vld [vmem:[#allocation5 + $0x148] sm:$0xff] }
  0xb6   : > { %4405 = vmatpush1.bf16.msra.mxu0 %v4404_v29  ;;  %4431 = vmatprep.subr.bf16.mxu1 %v4430_v43  ;;  %v4442_v4 = vpack.c.bf16 %v559_v2, %v556_v1  ;;  %v4446_v7 = vpack.c.bf16 %v565_v6, %v562_v5  ;;  %v568_v8 = vld [vmem:[#allocation5 + $0x160] sm:$0xff]  ;;  %v571_v9 = vld [vmem:[#allocation5 + $0x178] sm:$0xff]  ;;  %v5531_v10 = vld [vmem:[%s5509_s12 + $0x8] sm:$0xff] }
  0xb7   : > { %4407 = vmatprep.subr.bf16.mxu0 %v4406_v34  ;;  %v4450_v11 = vpack.c.bf16 %v571_v9, %v568_v8  ;;  %v522_v12 = vld [vmem:[%s5509_s12 + $0x10] sm:$0xff]  ;;  %v523_v13 = vld [vmem:[%s5509_s12 + $0x18] sm:$0xff]  ;;  %v572_v17 = vld [vmem:[%s6056_s2] sm:$0x7] }
  0xb8   : > { %v5545_v18 = vrot.slane %v572_v17, %v5539_v16  ;;  %v581_v23 = vrot.slane %v572_v17, %v5547_v19  ;;  %vm5560_vm1 = vmpackc.low %vm765_vm0, %vm765_vm0  ;;  %v585_v39 = vrot.slane %v572_v17, %v584_v38 }
  0xb9   : > { %4433 = vmatpush3.bf16.msra.mxu1 %v4430_v43 }
  0xba   : > { %4409 = vmatpush1.bf16.msra.mxu0 %v4408_v41  ;;  %4435 = vmatprep.subr.bf16.mxu1 %v4434_v52 }
  0xbb   : > { %4411 = vmatprep.subr.bf16.mxu0 %v4410_v44 }
  0xbd   : > { %4437 = vmatpush3.bf16.msra.mxu1 %v4434_v52 }
  0xbe   : > { %4413 = vmatpush1.bf16.msra.mxu0 %v4412_v50  ;;  %4439 = vmatprep.subr.bf16.mxu1 %v4438_v61 }
  0xbf   : > { %4415 = vmatprep.subr.bf16.mxu0 %v4414_v53 }
  0xc1   : > { %4441 = vmatpush3.bf16.msra.mxu1 %v4438_v61 }
  0xc2   : > { %4417 = vmatpush1.bf16.msra.mxu0 %v4416_v59  ;;  %4443 = vmatprep.subr.bf16.mxu1 %v4442_v4 }
  0xc3   : > { %4419 = vmatprep.subr.bf16.mxu0 %v4418_v62 }
  0xc5   : > { %4445 = vmatpush3.bf16.msra.mxu1 %v4442_v4 }
  0xc6   : > { %4421 = vmatpush1.bf16.msra.mxu0 %v4420_v3  ;;  %4447 = vmatprep.subr.bf16.mxu1 %v4446_v7 }
  0xc9   : > { %654 = vmatmul.mubr.f32.vlgmr.msra.gmra.mrb[0].mxu0 %v5525_v26  ;;  %4449 = vmatpush3.bf16.msra.mxu1 %v4446_v7 }
  0xca   : > { %659 = vmatprep.mubr.f32.mxu0 %v5209_v0  ;;  %4451 = vmatprep.subr.bf16.mxu1 %v4450_v11 }
  0xcd   : > { %660 = vmatmul.mubr.f32.gmra.mrb[2].mxu0 %v5531_v10  ;;  %4453 = vmatpush3.bf16.msra.mxu1 %v4450_v11 }
  0xce   : > { %665 = vmatprep.mubr.f32.mxu0 %v5209_v0 }
  0xd0   : > { %4185 = vmatmul.mubr.f32.vlgmr.msra.gmra.mrb[0].mxu1 %v5531_v10 }
  0xd1   : > { %4187 = vmatprep.mubr.f32.mxu1 %v522_v12  ;;  %666 = vmatmul.mubr.f32.gmra.mrb[4].mxu0 %v522_v12 }
  0xd2   : > { %671 = vmatprep.mubr.f32.mxu0 %v5209_v0 }
  0xd4   : > { %4188 = vmatmul.mubr.f32.gmra.mrb[2].mxu1 %v523_v13 }
  0xd5   : > { %672 = vmatmul.mubr.f32.gmra.mrb[6].mxu0 %v523_v13 }
 0x19c   : > { %v655_v20 = vpop.f32.mrb[0].mxu0 }
 0x19d   : > { %v656_v21 = vadd.f32 %v655_v20, %v5545_v18  ;;  %v657_v22 = vpop.f32.mrb[1].mxu0 }
 0x19e   : > { %v658_v28 = vadd.f32 %v657_v22, %v581_v23 }
 0x19f   : > { %v5551_v24 = vmul.f32 0.17677669, %v656_v21 }
 0x1a0   : > { %v661_v25 = vpop.f32.mrb[2].mxu0 }
 0x1a1   : > { %v662_v26 = vadd.f32 %v661_v25, %v5545_v18  ;;  %v663_v27 = vpop.f32.mrb[3].mxu0  ;;  %4194 = vmatprep.mubr.msk.f32.mxu1 %vm765_vm0, %v5551_v24 }
 0x1a2   : > { %v664_v29 = vadd.f32 %v663_v27, %v581_v23 }
 0x1a3   : > { %v5556_v30 = vmul.f32 0.17677669, %v662_v26  ;;  %v4186_v34 = vpop.f32.mrb[0].mxu1 }
 0x1a4   : > { %v5564_v32 = vpack.i.bf16 %v664_v29, %v658_v28  ;;  %v4454_v33 = vpack.c.bf16 %v664_v29, %v658_v28  ;;  %v744_v35 = vpop.f32.mrb[1].mxu1  ;;  %v750_v40 = vadd.f32 %v4186_v34, %v585_v39  ;;  %v5578_v42 = vpop.f32.mrb[4].mxu0 }
 0x1a5   : > { %963 = vrot.lane.b32.xlu1 %v5556_v30, %s5210_s11  ;;  %v745_v41 = vadd.f32 %v744_v35, %v585_v39  ;;  %v669_v44 = vpop.f32.mrb[5].mxu0 }
 0x1a6   : > { %4838 = vrot.lane.b32.xlu0 %v5564_v32, %s5210_s11  ;;  %4456 = vmatprep.subr.msk.bf16.mxu1 %vm5560_vm1, %v4454_v33  ;;  %v670_v55 = vadd.f32 %v669_v44, %v581_v23 }
 0x1a7   : > { %4459 = vmatpush3.bf16.xpose.msk.msra.mxu1 %vm5560_vm1, %v4454_v33  ;;  %v4189_v36 = vpop.f32.mrb[2].mxu1  ;;  %v4460_v43 = vpack.c.bf16 %v750_v40, %v745_v41  ;;  %v5604_v6 = vpack.i.bf16 %v750_v40, %v745_v41 }
 0x1a8   : > { %v754_v37 = vpop.f32.mrb[3].mxu1  ;;  %v5580_v45 = vpop.f32.mrb[6].mxu0  ;;  %v760_v53 = vadd.f32 %v4189_v36, %v585_v39 }
 0x1a9   : > { %4461 = vmatprep.subr.bf16.mxu1 %v4460_v43  ;;  %v675_v46 = vpop.f32.mrb[7].mxu0  ;;  %v755_v54 = vadd.f32 %v754_v37, %v585_v39 }
 0x1aa   : > { %961 = vrot.lane.b32.xlu0 %v5551_v24, %s5210_s11  ;;  %v676_v56 = vadd.f32 %v675_v46, %v581_v23 }
 0x1ab   : > { %v5588_v57 = vpack.c.bf16 %v760_v53, %v755_v54  ;;  %v5590_v58 = vpack.i.bf16 %v760_v53, %v755_v54 }
 0x1ac   : > { %v5592_v59 = vpack.i.bf16 %v676_v56, %v670_v55  ;;  %v5594_v60 = vpack.c.bf16 %v676_v56, %v670_v55 }
 0x1ae   : > { %4195 = vmatmul.mubr.msk.f32.vlgmr.msra.gmra.mrb[4].mxu1 %vm765_vm0, %v5556_v30 }
 0x1af   : > { %4463 = vmatpush3.bf16.msra.mxu1 %v4460_v43 }
 0x217   : > { %v964_v52 = vpop.permute.xlu1 %963 }
 0x218   : > { %v4839_v47 = vpop.permute.xlu0 %4838 }
 0x219   : > { %v4841_v48 = vunpack.i.h.bf16 %v4839_v47  ;;  %v4840_v49 = vunpack.i.l.bf16 %v4839_v47 }
 0x21b   : > { %v4464_v50 = vpack.c.bf16 %v4841_v48, %v4840_v49 }
 0x21c   : > { %v962_v51 = vpop.permute.xlu0 %961 }
 0x21d   : > { %4466 = vmatprep.subr.msk.bf16.mxu0 %vm5560_vm1, %v4464_v50  ;;  %4208 = vmatprep.mubr.msk.f32.mxu0 %vm765_vm0, %v962_v51 }
 0x21e   : > { %4469 = vmatpush3.bf16.xpose.msk.msra.mxu0 %vm5560_vm1, %v4464_v50 }
 0x225   : > { %4209 = vmatmul.mubr.msk.f32.vlgmr.msra.gmra.mrb[8].mxu0 %vm765_vm0, %v964_v52 }
 0x281   : > { %v4196_v61 = vpop.f32.mrb[4].mxu1 }
 0x282   : > { %v844_v62 = vpop.f32.mrb[5].mxu1  ;;  %v857_v63 = vsel %vm853_vm2, %v4196_v61, -inf }
 0x283   : > { %858 = vmax.xlane.f32.xlu0 %v857_v63  ;;  %v854_v1 = vsel %vm853_vm2, %v844_v62, -inf }
 0x284   : > { %855 = vmax.xlane.f32.xlu1 %v854_v1 }
 0x2f8   : > { %v4210_v2 = vpop.f32.mrb[8].mxu0 }
 0x2f9   : > { %v1043_v3 = vpop.f32.mrb[9].mxu0  ;;  %v1055_v4 = vsel %vm853_vm2, %v4210_v2, -inf }
 0x2fa   : > { %1056 = vmax.xlane.f32.xlu1 %v1055_v4  ;;  %v1052_v5 = vsel %vm853_vm2, %v1043_v3, -inf }
 0x2fb   : > { %1053 = vmax.xlane.f32.xlu0 %v1052_v5 }
 0x30b   : > { %4848 = vrot.lane.b32.xlu1 %v5564_v32, %s5211_s8 }
 0x30f   : > { %1329 = vrot.lane.b32.xlu1 %v5551_v24, %s5211_s8 }
 0x310   : > { %v859_v7 = vpop.xlane.xlu0 %858 }
 0x311   : > { %v861_v8 = vsub.f32 %v4196_v61, %v859_v7  ;;  %4843 = vrot.lane.b32.xlu0 %v5604_v6, %s5210_s11  ;;  %v856_v9 = vpop.xlane.xlu1 %855 }
 0x312   : > { %v860_v11 = vsub.f32 %v844_v62, %v856_v9 }
 0x313   : > { %v864_v12 = vmul.f32 1.442695, %v861_v8  ;;  %4858 = vrot.lane.b32.xlu1 %v5564_v32, %s5212_s21 }
 0x314   : > { %v862_v13 = vmul.f32 1.442695, %v860_v11 }
 0x315   : > { %1331 = vrot.lane.b32.xlu0 %v5556_v30, %s5211_s8 }
 0x316   : > { %4897 = vpow2.f32 %v862_v13 }
 0x317   : > { %4899 = vpow2.f32 %v864_v12 }
 0x320   : > { %v5612_v14 = vpop.eup %4897 }
 0x321   : > { %v5614_v15 = vpop.eup %4899  ;;  %4201 = vmatprep.mubr.msk.f32.mxu1 %vm853_vm2, %v5612_v14 }
 0x322   : > { %4202 = vmatmul.mubr.msk.f32.vlgmr.msra.gmra.mrb[6].mxu1 %vm853_vm2, %v5614_v15 }
 0x387   : > { %v1057_v17 = vpop.xlane.xlu1 %1056 }
 0x388   : > { %v1059_v20 = vsub.f32 %v4210_v2, %v1057_v17  ;;  %v1054_v21 = vpop.xlane.xlu0 %1053 }
 0x389   : > { %v1058_v22 = vsub.f32 %v1043_v3, %v1054_v21 }
 0x38a   : > { %v1062_v23 = vmul.f32 1.442695, %v1059_v20  ;;  %v668_v20 = vadd.f32 %v5578_v42, %v5545_v18 }
 0x38b   : > { %v1060_v25 = vmul.f32 1.442695, %v1058_v22  ;;  %v4849_v26 = vpop.permute.xlu1 %4848 }
 0x38c   : > { %v4851_v27 = vunpack.i.h.bf16 %v4849_v26  ;;  %v4844_v28 = vpop.permute.xlu0 %4843  ;;  %v4850_v29 = vunpack.i.l.bf16 %v4849_v26  ;;  %v5676_v21 = vmul.f32 0.17677669, %v668_v20 }
 0x38d   : > { %4901 = vpow2.f32 %v1060_v25  ;;  %v4846_v32 = vunpack.i.h.bf16 %v4844_v28  ;;  %v4845_v33 = vunpack.i.l.bf16 %v4844_v28 }
 0x38e   : > { %4903 = vpow2.f32 %v1062_v23  ;;  %v4490_v35 = vpack.c.bf16 %v4851_v27, %v4850_v29 }
 0x38f   : > { %v4470_v34 = vpack.c.bf16 %v4846_v32, %v4845_v33  ;;  %v1330_v38 = vpop.permute.xlu1 %1329 }
 0x390   : > { %v1332_v39 = vpop.permute.xlu0 %1331 }
 0x391   : > { %4471 = vmatprep.subr.bf16.mxu1 %v4470_v34 }
 0x392   : > { %4473 = vmatpush3.bf16.msra.mxu1 %v4470_v34 }
 0x393   : > { %4492 = vmatprep.subr.msk.bf16.mxu1 %vm5560_vm1, %v4490_v35  ;;  %v4859_v50 = vpop.permute.xlu1 %4858 }
 0x394   : > { %v4861_v62 = vunpack.i.h.bf16 %v4859_v50  ;;  %v4860_v63 = vunpack.i.l.bf16 %v4859_v50 }
 0x396   : > { %v4508_v3 = vpack.c.bf16 %v4861_v62, %v4860_v63 }
 0x397   : > { %v5622_v36 = vpop.eup %4901 }
 0x398   : > { %v5624_v37 = vpop.eup %4903  ;;  %4215 = vmatprep.mubr.msk.f32.mxu1 %vm853_vm2, %v5622_v36 }
 0x399   : > { %4216 = vmatmul.mubr.msk.f32.vlgmr.msra.gmra.mrb[8].mxu1 %vm853_vm2, %v5624_v37 }
 0x39a   : > { %4244 = vmatprep.mubr.msk.f32.mxu1 %vm765_vm0, %v1330_v38 }
 0x39b   : > { %4495 = vmatpush3.bf16.xpose.msk.msra.mxu1 %vm5560_vm1, %v4490_v35  ;;  %v674_v35 = vadd.f32 %v5580_v45, %v5545_v18 }
 0x39d   : > { %v1904_v38 = vmul.f32 0.17677669, %v674_v35  ;;  %v1166_v35 = vld [vmem:[#allocation7 + $0x38] sm:$0xff] }
 0x3a2   : > { %4245 = vmatmul.mubr.msk.f32.vlgmr.msra.gmra.mrb[10].mxu1 %vm765_vm0, %v1332_v39 }
 0x3f5   : > { %v5634_v40 = vpop.f32.mrb[6].mxu1 }
 0x3f6   : > { %v5636_v41 = vpop.f32.mrb[7].mxu1 }
 0x46c   : > { %v5638_v43 = vpop.f32.mrb[8].mxu1 }
 0x46d   : > { %v5640_v44 = vpop.f32.mrb[9].mxu1 }
 0x475   : > { %v4246_v46 = vpop.f32.mrb[10].mxu1 }
 0x476   : > { %v1411_v47 = vpop.f32.mrb[11].mxu1  ;;  %v1423_v48 = vsel %vm853_vm2, %v4246_v46, -inf }
 0x477   : > { %1424 = vmax.xlane.f32.xlu0 %v1423_v48  ;;  %v1420_v49 = vsel %vm853_vm2, %v1411_v47, -inf }
 0x478   : > { %1421 = vmax.xlane.f32.xlu1 %v1420_v49 }
 0x489   : > { %1616 = vrot.lane.b32.xlu1 %v5551_v24, %s5212_s21 }
 0x48d   : > { %4853 = vrot.lane.b32.xlu0 %v5604_v6, %s5211_s8 }
 0x491   : > { %1618 = vrot.lane.b32.xlu0 %v5556_v30, %s5212_s21 }
 0x504   : > { %v1425_v51 = vpop.xlane.xlu0 %1424 }
 0x505   : > { %v1427_v52 = vsub.f32 %v4246_v46, %v1425_v51  ;;  %v1422_v53 = vpop.xlane.xlu1 %1421 }
 0x506   : > { %v1426_v54 = vsub.f32 %v1411_v47, %v1422_v53 }
 0x507   : > { %v1430_v55 = vmul.f32 1.442695, %v1427_v52 }
 0x508   : > { %v1428_v56 = vmul.f32 1.442695, %v1426_v54  ;;  %v4854_v61 = vpop.permute.xlu0 %4853 }
 0x509   : > { %v4856_v1 = vunpack.i.h.bf16 %v4854_v61  ;;  %v4855_v2 = vunpack.i.l.bf16 %v4854_v61  ;;  %v1617_v5 = vpop.permute.xlu1 %1616 }
 0x50a   : > { %4905 = vpow2.f32 %v1428_v56 }
 0x50b   : > { %4907 = vpow2.f32 %v1430_v55  ;;  %v4496_v24 = vpack.c.bf16 %v4856_v1, %v4855_v2 }
 0x50c   : > { %v1619_v7 = vpop.permute.xlu0 %1618 }
 0x50d   : > { %4497 = vmatprep.subr.bf16.mxu1 %v4496_v24 }
 0x50e   : > { %4499 = vmatpush3.bf16.msra.mxu1 %v4496_v24 }
 0x50f   : > { %4510 = vmatprep.subr.msk.bf16.mxu1 %vm5560_vm1, %v4508_v3 }
 0x514   : > { %v5652_v30 = vpop.eup %4905 }
 0x515   : > { %v5654_v4 = vpop.eup %4907  ;;  %4251 = vmatprep.mubr.msk.f32.mxu1 %vm853_vm2, %v5652_v30 }
 0x516   : > { %4252 = vmatmul.mubr.msk.f32.vlgmr.msra.gmra.mrb[12].mxu1 %vm853_vm2, %v5654_v4 }
 0x517   : > { %4513 = vmatpush3.bf16.xpose.msk.msra.mxu1 %vm5560_vm1, %v4508_v3  ;;  %4269 = vmatprep.mubr.msk.f32.mxu1 %vm765_vm0, %v1617_v5 }
 0x51e   : > { %4270 = vmatmul.mubr.msk.f32.vlgmr.msra.gmra.mrb[14].mxu1 %vm765_vm0, %v1619_v7 }
 0x5e9   : > { %v5664_v8 = vpop.f32.mrb[12].mxu1 }
 0x5ea   : > { %v5666_v9 = vpop.f32.mrb[13].mxu1 }
 0x5f1   : > { %v4271_v11 = vpop.f32.mrb[14].mxu1 }
 0x5f2   : > { %v1698_v12 = vpop.f32.mrb[15].mxu1  ;;  %v1710_v13 = vsel %vm853_vm2, %v4271_v11, -inf }
 0x5f3   : > { %1711 = vmax.xlane.f32.xlu0 %v1710_v13  ;;  %v1707_v17 = vsel %vm853_vm2, %v1698_v12, -inf }
 0x5f4   : > { %1708 = vmax.xlane.f32.xlu1 %v1707_v17 }
 0x609   : > { %4863 = vrot.lane.b32.xlu0 %v5604_v6, %s5212_s21 }
 0x60d   : > { %4873 = vrot.lane.b32.xlu0 %v5592_v59, %s5211_s8 }
 0x611   : > { %2095 = vrot.lane.b32.xlu0 %v5676_v21, %s5210_s11 }
 0x615   : > { %2459 = vrot.lane.b32.xlu0 %v5676_v21, %s5211_s8 }
 0x680   : > { %v1712_v22 = vpop.xlane.xlu0 %1711 }
 0x681   : > { %v1714_v23 = vsub.f32 %v4271_v11, %v1712_v22  ;;  %v1709_v25 = vpop.xlane.xlu1 %1708 }
 0x682   : > { %v1713_v26 = vsub.f32 %v1698_v12, %v1709_v25 }
 0x683   : > { %v1717_v27 = vmul.f32 1.442695, %v1714_v23 }
 0x684   : > { %v1715_v6 = vmul.f32 1.442695, %v1713_v26  ;;  %v4864_v28 = vpop.permute.xlu0 %4863 }
 0x685   : > { %v4866_v29 = vunpack.i.h.bf16 %v4864_v28  ;;  %v4865_v42 = vunpack.i.l.bf16 %v4864_v28  ;;  %v1432_v28 = vsel %vm853_vm2, %v5652_v30, 0.0  ;;  %v1435_v30 = vsel %vm853_vm2, %v5654_v4, 0.0 }
 0x686   : > { %4909 = vpow2.f32 %v1715_v6  ;;  %v1064_v6 = vsel %vm853_vm2, %v5622_v36, 0.0 }
 0x687   : > { %4911 = vpow2.f32 %v1717_v27  ;;  %v4514_v32 = vpack.c.bf16 %v4866_v29, %v4865_v42  ;;  %v1067_v27 = vsel %vm853_vm2, %v5624_v37, 0.0  ;;  %v869_v37 = vsel %vm853_vm2, %v5614_v15, 0.0  ;;  %v1164_v42 = vld [vmem:[#allocation7 + $0x28] sm:$0xff] }
 0x688   : > { %v4874_v61 = vpop.permute.xlu0 %4873 }
 0x689   : > { %4515 = vmatprep.subr.bf16.mxu1 %v4514_v32  ;;  %v4876_v62 = vunpack.i.h.bf16 %v4874_v61  ;;  %v4875_v63 = vunpack.i.l.bf16 %v4874_v61 }
 0x68a   : > { %4517 = vmatpush3.bf16.msra.mxu1 %v4514_v32 }
 0x68b   : > { %4528 = vmatprep.subr.msk.bf16.mxu1 %vm5560_vm1, %v5594_v60  ;;  %v4562_v24 = vpack.c.bf16 %v4876_v62, %v4875_v63 }
 0x68c   : > { %v2096_v3 = vpop.permute.xlu0 %2095 }
 0x690   : > { %v5685_v33 = vpop.eup %4909  ;;  %v2460_v7 = vpop.permute.xlu0 %2459 }
 0x691   : > { %v5687_v34 = vpop.eup %4911  ;;  %4276 = vmatprep.mubr.msk.f32.mxu1 %vm853_vm2, %v5685_v33  ;;  %v1719_v29 = vsel %vm853_vm2, %v5685_v33, 0.0  ;;  %v1165_v33 = vld [vmem:[#allocation7 + $0x30] sm:$0xff] }
 0x692   : > { %4277 = vmatmul.mubr.msk.f32.vlgmr.msra.gmra.mrb[16].mxu1 %vm853_vm2, %v5687_v34  ;;  %v5774_v4 = vpack.c.bf16 %v1166_v35, %v1165_v33  ;;  %v1531_v35 = vld [vmem:[#allocation7 + $0x50] sm:$0xff] }
 0x693   : > { %4531 = vmatpush3.bf16.xpose.msk.msra.mxu1 %vm5560_vm1, %v5594_v60  ;;  %4294 = vmatprep.mubr.msk.f32.mxu1 %vm765_vm0, %v5676_v21 }
 0x694   : > { %4533 = vmatprep.subr.bf16.mxu1 %v5588_v57 }
 0x69a   : > { %4295 = vmatmul.mubr.msk.f32.vlgmr.msra.gmra.mrb[18].mxu1 %vm765_vm0, %v1904_v38 }
 0x69b   : > { %4535 = vmatpush3.bf16.msra.mxu1 %v5588_v57 }
 0x765   : > { %v5703_v39 = vpop.f32.mrb[16].mxu1 }
 0x766   : > { %v5705_v46 = vpop.f32.mrb[17].mxu1 }
 0x76d   : > { %v4296_v47 = vpop.f32.mrb[18].mxu1 }
 0x76e   : > { %v1983_v48 = vpop.f32.mrb[19].mxu1  ;;  %v1995_v60 = vsel %vm853_vm2, %v4296_v47, -inf }
 0x76f   : > { %1996 = vmax.xlane.f32.xlu1 %v1995_v60  ;;  %v1992_v49 = vsel %vm853_vm2, %v1983_v48, -inf }
 0x773   : > { %1993 = vmax.xlane.f32.xlu1 %v1992_v49 }
 0x784   : > { %4868 = vrot.lane.b32.xlu1 %v5592_v59, %s5210_s11 }
 0x788   : > { %2097 = vrot.lane.b32.xlu1 %v1904_v38, %s5210_s11 }
 0x78c   : > { %2461 = vrot.lane.b32.xlu1 %v1904_v38, %s5211_s8 }
 0x7fc   : > { %v1997_v18 = vpop.xlane.xlu1 %1996 }
 0x7fd   : > { %v1999_v45 = vsub.f32 %v4296_v47, %v1997_v18 }
 0x7ff   : > { %v2002_v51 = vmul.f32 1.442695, %v1999_v45 }
 0x800   : > { %v1994_v57 = vpop.xlane.xlu1 %1993 }
 0x801   : > { %v1998_v50 = vsub.f32 %v1983_v48, %v1994_v57 }
 0x803   : > { %v2000_v52 = vmul.f32 1.442695, %v1998_v50 }
 0x804   : > { %v4869_v53 = vpop.permute.xlu1 %4868 }
 0x805   : > { %4913 = vpow2.f32 %v2000_v52  ;;  %v4871_v54 = vunpack.i.h.bf16 %v4869_v53  ;;  %v4870_v55 = vunpack.i.l.bf16 %v4869_v53 }
 0x806   : > { %4915 = vpow2.f32 %v2002_v51 }
 0x807   : > { %v4536_v56 = vpack.c.bf16 %v4871_v54, %v4870_v55 }
 0x808   : > { %v2098_v5 = vpop.permute.xlu1 %2097 }
 0x809   : > { %4538 = vmatprep.subr.msk.bf16.mxu1 %vm5560_vm1, %v4536_v56 }
 0x80c   : > { %v2462_v11 = vpop.permute.xlu1 %2461 }
 0x80f   : > { %v5715_v1 = vpop.eup %4913 }
 0x810   : > { %v5717_v2 = vpop.eup %4915  ;;  %4301 = vmatprep.mubr.msk.f32.mxu1 %vm853_vm2, %v5715_v1 }
 0x811   : > { %4302 = vmatmul.mubr.msk.f32.vlgmr.msra.gmra.mrb[20].mxu1 %vm853_vm2, %v5717_v2 }
 0x812   : > { %4541 = vmatpush3.bf16.xpose.msk.msra.mxu1 %vm5560_vm1, %v4536_v56  ;;  %4308 = vmatprep.mubr.msk.f32.mxu1 %vm765_vm0, %v2096_v3 }
 0x813   : > { %4564 = vmatprep.subr.msk.bf16.mxu1 %vm5560_vm1, %v4562_v24 }
 0x819   : > { %4309 = vmatmul.mubr.msk.f32.vlgmr.msra.gmra.mrb[22].mxu1 %vm765_vm0, %v2098_v5 }
 0x81a   : > { %4567 = vmatpush3.bf16.xpose.msk.msra.mxu1 %vm5560_vm1, %v4562_v24  ;;  %4344 = vmatprep.mubr.msk.f32.mxu1 %vm765_vm0, %v2460_v7 }
 0x821   : > { %4345 = vmatmul.mubr.msk.f32.vlgmr.msra.gmra.mrb[24].mxu1 %vm765_vm0, %v2462_v11 }
 0x8e4   : > { %v5733_v12 = vpop.f32.mrb[20].mxu1 }
 0x8e5   : > { %v5735_v13 = vpop.f32.mrb[21].mxu1 }
 0x8ec   : > { %v5737_v17 = vpop.f32.mrb[22].mxu1 }
 0x8ed   : > { %v5739_v20 = vpop.f32.mrb[23].mxu1  ;;  %v2189_v15 = vsel %vm853_vm2, %v5737_v17, -inf }
 0x8ee   : > { %v2186_v36 = vsel %vm853_vm2, %v5739_v20, -inf }
 0x8f4   : > { %v4346_v22 = vpop.f32.mrb[24].mxu1 }
 0x8f5   : > { %v2541_v23 = vpop.f32.mrb[25].mxu1  ;;  %v2553_v25 = vsel %vm853_vm2, %v4346_v22, -inf }
 0x8f6   : > { %2554 = vmax.xlane.f32.xlu1 %v2553_v25  ;;  %v2550_v26 = vsel %vm853_vm2, %v2541_v23, -inf }
 0x8f7   : > { %2551 = vmax.xlane.f32.xlu0 %v2550_v26 }
 0x907   : > { %4883 = vrot.lane.b32.xlu1 %v5592_v59, %s5212_s21  ;;  %v866_v59 = vsel %vm853_vm2, %v5612_v14, 0.0  ;;  %v1722_v14 = vsel %vm853_vm2, %v5687_v34, 0.0  ;;  %v957_v34 = vld [vmem:[#allocation7] sm:$0xff] }
 0x90b   : > { %2744 = vrot.lane.b32.xlu1 %v1904_v38, %s5212_s21  ;;  %v958_v38 = vld [vmem:[#allocation7 + $0x8] sm:$0xff] }
 0x90c   : > { %v5778_v47 = vpack.c.bf16 %v958_v38, %v957_v34  ;;  %v1532_v34 = vld [vmem:[#allocation7 + $0x58] sm:$0xff] }
 0x90d   : > { %4878 = vrot.lane.b32.xlu0 %v5590_v58, %s5211_s8 }
 0x911   : > { %2742 = vrot.lane.b32.xlu0 %v5676_v21, %s5212_s21  ;;  %v1163_v21 = vld [vmem:[#allocation7 + $0x20] sm:$0xff] }
 0x912   : > { %v5768_v32 = vpack.c.bf16 %v1164_v42, %v1163_v21  ;;  %v1529_v21 = vld [vmem:[#allocation7 + $0x40] sm:$0xff]  ;;  %v1530_v42 = vld [vmem:[#allocation7 + $0x48] sm:$0xff] }
 0x914   : > { %4475 = vmatprep.subr.bf16.mxu0 %v5768_v32 }
 0x915   : > { %4477 = vmatpush3.bf16.msra.mxu0 %v5768_v32 }
 0x916   : > { %4479 = vmatprep.subr.bf16.mxu0 %v5774_v4 }
 0x919   : > { %4481 = vmatpush3.bf16.msra.mxu0 %v5774_v4 }
 0x91a   : > { %4483 = vmatprep.subr.bf16.mxu0 %v5778_v47 }
 0x92f   : > { %1068 = vadd.xlane.f32.xlu1 %v1067_v27  ;;  %v959_v27 = vld [vmem:[#allocation7 + $0x10] sm:$0xff] }
 0x930   : > { %1065 = vadd.xlane.f32.xlu0 %v1064_v6  ;;  %v960_v6 = vld [vmem:[#allocation7 + $0x18] sm:$0xff] }
 0x933   : > { %1433 = vadd.xlane.f32.xlu1 %v1432_v28 }
 0x934   : > { %867 = vadd.xlane.f32.xlu0 %v866_v59 }
 0x937   : > { %1720 = vadd.xlane.f32.xlu1 %v1719_v29 }
 0x938   : > { %870 = vadd.xlane.f32.xlu0 %v869_v37 }
 0x93b   : > { %2187 = vmax.xlane.f32.xlu1 %v2186_v36 }
 0x93c   : > { %1436 = vadd.xlane.f32.xlu0 %v1435_v30  ;;  %v5800_v30 = vpack.c.bf16 %v960_v6, %v959_v27 }
 0x940   : > { %1723 = vadd.xlane.f32.xlu0 %v1722_v14 }
 0x944   : > { %2190 = vmax.xlane.f32.xlu0 %v2189_v15 }
 0x94c   : > { %4888 = vrot.lane.b32.xlu1 %v5590_v58, %s5210_s11  ;;  %s6101_s11 = sld [smem:[#allocation22_spill]] }
 0x952   : > { %s6008_s8 = scalar_lea.hbm %s6101_s11, %s3931_s22 }
 0x983   : > { %v2555_v48 = vpop.xlane.xlu1 %2554 }
 0x984   : > { %v2557_v60 = vsub.f32 %v4346_v22, %v2555_v48  ;;  %v2552_v49 = vpop.xlane.xlu0 %2551 }
 0x985   : > { %v2556_v18 = vsub.f32 %v2541_v23, %v2552_v49  ;;  %v5813_v49 = vpack.c.bf16 %v1532_v34, %v1531_v35  ;;  %v5865_v34 = vld [vmem:[%s6058_s4] ss:$0 sm:$0xff] }
 0x986   : > { %v2560_v45 = vmul.f32 1.442695, %v2557_v60 }
 0x987   : > { %v2558_v57 = vmul.f32 1.442695, %v2556_v18  ;;  %v4884_v50 = vpop.permute.xlu1 %4883  ;;  %v1816_v18 = vld [vmem:[#allocation7 + $0x60] sm:$0xff] }
 0x988   : > { %v4886_v51 = vunpack.i.h.bf16 %v4884_v50  ;;  %v4879_v52 = vpop.permute.xlu0 %4878  ;;  %v4885_v53 = vunpack.i.l.bf16 %v4884_v50 }
 0x989   : > { %4917 = vpow2.f32 %v2558_v57  ;;  %v4881_v54 = vunpack.i.h.bf16 %v4879_v52  ;;  %v4880_v55 = vunpack.i.l.bf16 %v4879_v52  ;;  %v1818_v52 = vld [vmem:[#allocation7 + $0x70] sm:$0xff] }
 0x98a   : > { %4919 = vpow2.f32 %v2560_v45  ;;  %v4580_v61 = vpack.c.bf16 %v4886_v51, %v4885_v53  ;;  %v1817_v45 = vld [vmem:[#allocation7 + $0x68] sm:$0xff]  ;;  %v1819_v53 = vld [vmem:[#allocation7 + $0x78] sm:$0xff] }
 0x98b   : > { %v4568_v56 = vpack.c.bf16 %v4881_v54, %v4880_v55  ;;  %v2745_v3 = vpop.permute.xlu1 %2744  ;;  %v5821_v50 = vpack.c.bf16 %v1817_v45, %v1816_v18 }
 0x98c   : > { %v2743_v24 = vpop.permute.xlu0 %2742 }
 0x98d   : > { %4569 = vmatprep.subr.bf16.mxu1 %v4568_v56 }
 0x98e   : > { %4571 = vmatpush3.bf16.msra.mxu1 %v4568_v56 }
 0x98f   : > { %4582 = vmatprep.subr.msk.bf16.mxu1 %vm5560_vm1, %v4580_v61 }
 0x993   : > { %v5785_v62 = vpop.eup %4917 }
 0x994   : > { %v5787_v63 = vpop.eup %4919  ;;  %4351 = vmatprep.mubr.msk.f32.mxu1 %vm853_vm2, %v5785_v62 }
 0x995   : > { %4352 = vmatmul.mubr.msk.f32.vlgmr.msra.gmra.mrb[26].mxu1 %vm853_vm2, %v5787_v63  ;;  %v2565_v6 = vsel %vm853_vm2, %v5787_v63, 0.0 }
 0x996   : > { %4369 = vmatprep.mubr.msk.f32.mxu1 %vm765_vm0, %v2743_v24 }
 0x997   : > { %4585 = vmatpush3.bf16.xpose.msk.msra.mxu1 %vm5560_vm1, %v4580_v61  ;;  %v5827_v61 = vpack.c.bf16 %v1819_v53, %v1818_v52 }
 0x99e   : > { %4370 = vmatmul.mubr.msk.f32.vlgmr.msra.gmra.mrb[28].mxu1 %vm765_vm0, %v2745_v3 }
 0x9bc   : > { %v1069_v5 = vpop.xlane.xlu1 %1068 }
 0x9bd   : > { %4921 = vrcp.f32 %v1069_v5  ;;  %v1066_v7 = vpop.xlane.xlu0 %1065 }
 0x9be   : > { %4923 = vrcp.f32 %v1066_v7  ;;  %v2004_v7 = vsel %vm853_vm2, %v5715_v1, 0.0  ;;  %v2562_v1 = vsel %vm853_vm2, %v5785_v62, 0.0 }
 0x9c0   : > { %v1434_v11 = vpop.xlane.xlu1 %1433 }
 0x9c1   : > { %v868_v22 = vpop.xlane.xlu0 %867 }
 0x9c2   : > { %4925 = vrcp.f32 %v868_v22 }
 0x9c3   : > { %4927 = vrcp.f32 %v1434_v11 }
 0x9c4   : > { %v1721_v23 = vpop.xlane.xlu1 %1720 }
 0x9c5   : > { %v871_v25 = vpop.xlane.xlu0 %870 }
 0x9c6   : > { %4929 = vrcp.f32 %v871_v25 }
 0x9c7   : > { %v4922_v26 = vpop.eup %4921 }
 0x9c8   : > { %v4924_v28 = vpop.eup %4923  ;;  %v2188_v31 = vpop.xlane.xlu1 %2187  ;;  %v1162_v36 = vmul.f32 %v4922_v26, %v5638_v43  ;;  %v5807_v43 = vpack.c.bf16 %v1530_v42, %v1529_v21 }
 0x9c9   : > { %v2192_v59 = vsub.f32 %v5739_v20, %v2188_v31  ;;  %v1437_v29 = vpop.xlane.xlu0 %1436  ;;  %v1161_v37 = vmul.f32 %v4924_v28, %v5640_v44 }
 0x9ca   : > { %4931 = vrcp.f32 %v1437_v29 }
 0x9cb   : > { %v2194_v14 = vmul.f32 1.442695, %v2192_v59  ;;  %4226 = vmatprep.mubr.msk.f32.mxu0 %vm765_vm0, %v1161_v37 }
 0x9cc   : > { %v4926_v15 = vpop.eup %4925  ;;  %4227 = vmatmul.mubr.msk.f32.vlgmr.msra.gmra.mrb[10].mxu0 %vm765_vm0, %v1162_v36  ;;  %v4889_v55 = vpop.permute.xlu1 %4888 }
 0x9cd   : > { %4933 = vpow2.f32 %v2194_v14  ;;  %4485 = vmatpush3.bf16.msra.mxu0 %v5778_v47  ;;  %v1724_v20 = vpop.xlane.xlu0 %1723  ;;  %v955_v33 = vmul.f32 %v4926_v15, %v5636_v41  ;;  %v4928_v44 = vpop.eup %4927  ;;  %v4891_v3 = vunpack.i.h.bf16 %v4889_v55  ;;  %v4890_v5 = vunpack.i.l.bf16 %v4889_v55 }
 0x9ce   : > { %4935 = vrcp.f32 %v1721_v23  ;;  %4487 = vmatprep.subr.bf16.mxu0 %v5800_v30  ;;  %v1527_v41 = vmul.f32 %v4928_v44, %v5666_v9 }
 0x9cf   : > { %4237 = vmatprep.mubr.msk.f32.mxu0 %vm765_vm0, %v955_v33  ;;  %4937 = vrcp.f32 %v1724_v20  ;;  %v4542_v11 = vpack.c.bf16 %v4891_v3, %v4890_v5 }
 0x9d0   : > { %v4930_v38 = vpop.eup %4929 }
 0x9d1   : > { %v956_v48 = vmul.f32 %v4930_v38, %v5634_v40  ;;  %4489 = vmatpush3.bf16.msra.mxu0 %v5800_v30  ;;  %v2191_v60 = vpop.xlane.xlu0 %2190 }
 0x9d2   : > { %4501 = vmatprep.subr.bf16.mxu0 %v5807_v43  ;;  %v2193_v57 = vsub.f32 %v5737_v17, %v2191_v60 }
 0x9d4   : > { %4238 = vmatmul.mubr.msk.f32.vlgmr.msra.gmra.mrb[10].mxu0 %vm765_vm0, %v956_v48  ;;  %v4932_v40 = vpop.eup %4931  ;;  %v2196_v56 = vmul.f32 1.442695, %v2193_v57 }
 0x9d5   : > { %4503 = vmatpush3.bf16.msra.mxu0 %v5807_v43  ;;  %4262 = vmatprep.mubr.msk.f32.mxu0 %vm765_vm0, %v1527_v41  ;;  %v1528_v17 = vmul.f32 %v4932_v40, %v5664_v8  ;;  %v4977_v40 = vld [vmem:[%s5509_s12] sm:$0xff] }
 0x9d6   : > { %4505 = vmatprep.subr.bf16.mxu0 %v5813_v49  ;;  %4939 = vpow2.f32 %v2196_v56 }
 0x9d7   : > { %v4934_v51 = vpop.eup %4933 }
 0x9d8   : > { %v4936_v9 = vpop.eup %4935  ;;  %v2198_v54 = vsel %vm853_vm2, %v4934_v51, 0.0 }
 0x9d9   : > { %4507 = vmatpush3.bf16.msra.mxu0 %v5813_v49  ;;  %2199 = vadd.xlane.f32.xlu1 %v2198_v54  ;;  %v1814_v24 = vmul.f32 %v4936_v9, %v5705_v46  ;;  %v4938_v8 = vpop.eup %4937  ;;  %v2007_v46 = vsel %vm853_vm2, %v5717_v2, 0.0 }
 0x9da   : > { %4519 = vmatprep.subr.bf16.mxu0 %v5821_v50  ;;  %v1815_v22 = vmul.f32 %v4938_v8, %v5703_v39 }
 0x9dc   : > { %4263 = vmatmul.mubr.msk.f32.vlgmr.msra.gmra.mrb[10].mxu0 %vm765_vm0, %v1528_v17 }
 0x9dd   : > { %4521 = vmatpush3.bf16.msra.mxu0 %v5821_v50  ;;  %4287 = vmatprep.mubr.msk.f32.mxu0 %vm765_vm0, %v1814_v24 }
 0x9de   : > { %2005 = vadd.xlane.f32.xlu1 %v2004_v7  ;;  %4523 = vmatprep.subr.bf16.mxu0 %v5827_v61 }
 0x9e0   : > { %v4940_v23 = vpop.eup %4939 }
 0x9e1   : > { %4525 = vmatpush3.bf16.msra.mxu0 %v5827_v61 }
 0x9e2   : > { %2008 = vadd.xlane.f32.xlu1 %v2007_v46  ;;  %4543 = vmatprep.subr.bf16.mxu0 %v4542_v11 }
 0x9e4   : > { %4288 = vmatmul.mubr.msk.f32.vlgmr.msra.gmra.mrb[10].mxu0 %vm765_vm0, %v1815_v22 }
 0x9e5   : > { %4545 = vmatpush3.bf16.msra.mxu0 %v4542_v11  ;;  %4315 = vmatprep.mubr.msk.f32.mxu0 %vm853_vm2, %v4934_v51 }
 0x9e6   : > { %2563 = vadd.xlane.f32.xlu1 %v2562_v1  ;;  %4547 = vmatprep.subr.bf16.mxu0 %v5768_v32 }
 0x9e8   : > { %4316 = vmatmul.mubr.msk.f32.vlgmr.msra.gmra.mrb[12].mxu0 %vm853_vm2, %v4940_v23 }
 0x9e9   : > { %4549 = vmatpush3.bf16.msra.mxu0 %v5768_v32  ;;  %v2201_v32 = vsel %vm853_vm2, %v4940_v23, 0.0  ;;  %v3110_v23 = vld [vmem:[#allocation8 + $0x28] sm:$0xff] }
 0x9ea   : > { %4551 = vmatprep.subr.bf16.mxu0 %v5774_v4 }
 0x9ed   : > { %4553 = vmatpush3.bf16.msra.mxu0 %v5774_v4 }
 0x9ee   : > { %4555 = vmatprep.subr.bf16.mxu0 %v5778_v47 }
 0xa66   : > { %v2200_v4 = vpop.xlane.xlu1 %2199 }
 0xa67   : > { %4941 = vrcp.f32 %v2200_v4  ;;  %v3282_v4 = vld [vmem:[#allocation8 + $0x30] sm:$0xff] }
 0xa68   : > { %v5850_v39 = vpop.f32.mrb[26].mxu1 }
 0xa69   : > { %v5852_v2 = vpop.f32.mrb[27].mxu1 }
 0xa71   : > { %v4371_v25 = vpop.f32.mrb[28].mxu1  ;;  %v4942_v29 = vpop.eup %4941 }
 0xa72   : > { %v2824_v62 = vpop.f32.mrb[29].mxu1  ;;  %v2836_v26 = vsel %vm853_vm2, %v4371_v25, -inf }
 0xa73   : > { %2837 = vmax.xlane.f32.xlu0 %v2836_v26  ;;  %v2833_v27 = vsel %vm853_vm2, %v2824_v62, -inf }
 0xa77   : > { %2834 = vmax.xlane.f32.xlu0 %v2833_v27 }
 0xa8d   : > { %4893 = vrot.lane.b32.xlu0 %v5590_v58, %s5212_s21  ;;  %s6098_s21 = sld [smem:[#allocation19_spill]] }
 0xaac   : > { %2202 = vadd.xlane.f32.xlu0 %v2201_v32  ;;  %v3280_v32 = vld [vmem:[#allocation8 + $0x10] sm:$0xff] }
 0xab0   : > { %2566 = vadd.xlane.f32.xlu0 %v2565_v6  ;;  %v3112_v6 = vld [vmem:[#allocation8 + $0x48] sm:$0xff] }
 0xab7   : > { %v4289_v28 = vpop.f32.mrb[10].mxu0 }
 0xab8   : > { %v1892_v31 = vpop.f32.mrb[11].mxu0  ;;  %v3033_v48 = vadd.f32 %v4289_v28, %v5865_v34  ;;  %v4632_v28 = vpack.c.bf16 %v3282_v4, %v3280_v32  ;;  %v3125_v32 = vld [vmem:[#allocation8 + $0x120] sm:$0xff] }
 0xab9   : > { %v3032_v45 = vadd.f32 %v5865_v34, %v1892_v31  ;;  %v3114_v31 = vld [vmem:[#allocation8 + $0x68] sm:$0xff] }
 0xaba   : > { %v5870_v18 = vadd.f32 %v3033_v48, %v5531_v10  ;;  %v2006_v10 = vpop.xlane.xlu1 %2005 }
 0xabb   : > { %v4317_v59 = vpop.f32.mrb[12].mxu0  ;;  %v5879_v51 = vadd.f32 %v4977_v40, %v3032_v45 }
 0xabc   : > { %v2284_v37 = vpop.f32.mrb[13].mxu0 }
 0xabd   : > { %v2295_v36 = vmul.f32 %v4942_v29, %v2284_v37  ;;  %v3287_v29 = vld [vmem:[#allocation8 + $0x78] sm:$0xff]  ;;  %v4602_v37 = vpack.c.bf16 %v3114_v31, %v3112_v6  ;;  %v3298_v31 = vld [vmem:[#allocation8 + $0x130] sm:$0xff] }
 0xabe   : > { %v2009_v52 = vpop.xlane.xlu1 %2008 }
 0xabf   : > { %4326 = vmatprep.mubr.msk.f32.mxu0 %vm765_vm0, %v2295_v36 }
 0xac2   : > { %v2564_v9 = vpop.xlane.xlu1 %2563 }
 0xb00   : > { %v2838_v14 = vpop.xlane.xlu0 %2837 }
 0xb01   : > { %v2840_v21 = vsub.f32 %v4371_v25, %v2838_v14  ;;  %v3107_v25 = vld [vmem:[#allocation8] sm:$0xff] }
 0xb02   : > { %v3111_v14 = vld [vmem:[#allocation8 + $0x40] sm:$0xff] }
 0xb03   : > { %v2843_v58 = vmul.f32 1.442695, %v2840_v21  ;;  %v3113_v21 = vld [vmem:[#allocation8 + $0x60] sm:$0xff] }
 0xb04   : > { %v2835_v42 = vpop.xlane.xlu0 %2834 }
 0xb05   : > { %4943 = vpow2.f32 %v2843_v58  ;;  %v2839_v15 = vsub.f32 %v2824_v62, %v2835_v42  ;;  %v3109_v62 = vld [vmem:[#allocation8 + $0x20] sm:$0xff]  ;;  %v3284_v58 = vld [vmem:[#allocation8 + $0x50] sm:$0xff]  ;;  %v4604_v42 = vpack.c.bf16 %v3113_v21, %v3111_v14  ;;  %v3303_v14 = vld [vmem:[#allocation8 + $0x178] sm:$0xff] }
 0xb06   : > { %v4600_v27 = vpack.c.bf16 %v3109_v62, %v3107_v25  ;;  %v3297_v25 = vld [vmem:[#allocation8 + $0x118] sm:$0xff] }
 0xb07   : > { %v2841_v20 = vmul.f32 1.442695, %v2839_v15  ;;  %v3286_v15 = vld [vmem:[#allocation8 + $0x70] sm:$0xff] }
 0xb08   : > { %v4894_v33 = vpop.permute.xlu0 %4893 }
 0xb09   : > { %4945 = vpow2.f32 %v2841_v20  ;;  %v4896_v63 = vunpack.i.h.bf16 %v4894_v33  ;;  %v4895_v44 = vunpack.i.l.bf16 %v4894_v33  ;;  %v4636_v20 = vpack.c.bf16 %v3286_v15, %v3284_v58  ;;  %v3129_v15 = vld [vmem:[#allocation8 + $0x160] sm:$0xff] }
 0xb0a   : > { %4947 = vrcp.f32 %v2006_v10 }
 0xb0b   : > { %v4586_v35 = vpack.c.bf16 %v4896_v63, %v4895_v44 }
 0xb0d   : > { %4587 = vmatprep.subr.bf16.mxu1 %v4586_v35 }
 0xb0e   : > { %4589 = vmatpush3.bf16.msra.mxu1 %v4586_v35 }
 0xb0f   : > { %v4944_v38 = vpop.eup %4943 }
 0xb10   : > { %v2848_v60 = vsel %vm853_vm2, %v4944_v38, 0.0 }
 0xb11   : > { %2849 = vadd.xlane.f32.xlu0 %v2848_v60 }
 0xb13   : > { %v4946_v41 = vpop.eup %4945 }
 0xb14   : > { %4376 = vmatprep.mubr.msk.f32.mxu1 %vm853_vm2, %v4946_v41  ;;  %v2845_v57 = vsel %vm853_vm2, %v4946_v41, 0.0  ;;  %v4948_v54 = vpop.eup %4947 }
 0xb15   : > { %4377 = vmatmul.mubr.msk.f32.vlgmr.msra.gmra.mrb[30].mxu1 %vm853_vm2, %v4944_v38  ;;  %3042 = vadd.xlane.f32.xlu0 %v5870_v18  ;;  %v2093_v24 = vmul.f32 %v4948_v54, %v5735_v13  ;;  %v3118_v54 = vld [vmem:[#allocation8 + $0xa8] sm:$0xff] }
 0xb16   : > { %2846 = vadd.xlane.f32.xlu1 %v2845_v57  ;;  %3215 = vmatprep.mubr.f32.mxu1 %v5209_v0  ;;  %v4978_v57 = vld [vmem:[%s5509_s12 + $0x18] sm:$0xff] }
 0xb1a   : > { %3040 = vadd.xlane.f32.xlu1 %v5879_v51 }
 0xb39   : > { %v2203_v53 = vpop.xlane.xlu0 %2202 }
 0xb3a   : > { %4949 = vrcp.f32 %v2203_v53 }
 0xb3b   : > { %4951 = vrcp.f32 %v2009_v52  ;;  %v4979_v52 = vld [vmem:[%s5509_s12 + $0x10] sm:$0xff]  ;;  %s3723_s12 = sshll.u32 %s517_s25, 4  ;;  %s6010_s12 = int_to_ptr.vmem [resolvable:$true] %s3723_s12 }
 0xb3c   : > { %4953 = vrcp.f32 %v2564_v9  ;;  %s5122_s1 = scalar_lea.vmem %s6010_s12, 512  ;;  %p5129_p12 = scmp.lt.s32.totalorder %s6010_s12, %s5127_s19 }
 0xb3d   : > { %v2567_v17 = vpop.xlane.xlu0 %2566  ;;  %p5123_p3 = scmp.ne.s32.totalorder %s6010_s12, %s5122_s1 }
 0xb3e   : > { %4955 = vrcp.f32 %v2567_v17  ;;  %v3115_v17 = vld [vmem:[#allocation8 + $0x80] sm:$0xff] }
 0xb3f   : > { %p5124_p5 = pnand %p5123_p3, %p5448_p10 }
 0xb41   : > { %p5125_p7 = pneg %p5124_p5 }
 0xb44   : > { %v4950_v55 = vpop.eup %4949 }
 0xb45   : > { %v2296_v56 = vmul.f32 %v4950_v55, %v4317_v59  ;;  %v4952_v3 = vpop.eup %4951  ;;  %v3285_v59 = vld [vmem:[#allocation8 + $0x58] sm:$0xff] }
 0xb46   : > { %v4954_v5 = vpop.eup %4953  ;;  %v2094_v7 = vmul.f32 %v4952_v3, %v5733_v12  ;;  %v4634_v36 = vpack.c.bf16 %v3287_v29, %v3285_v59  ;;  %v3289_v55 = vld [vmem:[#allocation8 + $0x98] sm:$0xff]  ;;  %v3128_v59 = vld [vmem:[#allocation8 + $0x148] sm:$0xff] }
 0xb47   : > { %4327 = vmatmul.mubr.msk.f32.vlgmr.msra.gmra.mrb[14].mxu0 %vm765_vm0, %v2296_v56  ;;  %v2657_v8 = vmul.f32 %v4954_v5, %v5852_v2  ;;  %v3283_v2 = vld [vmem:[#allocation8 + $0x38] sm:$0xff] }
 0xb48   : > { %4557 = vmatpush3.bf16.msra.mxu0 %v5778_v47  ;;  %4337 = vmatprep.mubr.msk.f32.mxu0 %vm765_vm0, %v2093_v24  ;;  %v4956_v13 = vpop.eup %4955  ;;  %v3291_v56 = vld [vmem:[#allocation8 + $0xb8] sm:$0xff]  ;;  %v3117_v24 = vld [vmem:[#allocation8 + $0xa0] sm:$0xff] }
 0xb49   : > { %4559 = vmatprep.subr.bf16.mxu0 %v5800_v30  ;;  %v2658_v47 = vmul.f32 %v4956_v13, %v5850_v39  ;;  %v3281_v39 = vld [vmem:[#allocation8 + $0x18] sm:$0xff]  ;;  %v4638_v3 = vpack.c.bf16 %v3291_v56, %v3289_v55  ;;  %v4608_v5 = vpack.c.bf16 %v3117_v24, %v3115_v17  ;;  %v3136_v55 = vld [vmem:[#allocation8 + $0x1c8] sm:$0xff] }
 0xb4a   : > { %v4630_v26 = vpack.c.bf16 %v3283_v2, %v3281_v39  ;;  %v3126_v2 = vld [vmem:[#allocation8 + $0x128] sm:$0xff]  ;;  %v3309_v56 = vld [vmem:[#allocation8 + $0x1d8] sm:$0xff] }
 0xb4c   : > { %4561 = vmatpush3.bf16.msra.mxu0 %v5800_v30 }
 0xb4d   : > { %4573 = vmatprep.subr.bf16.mxu0 %v5807_v43 }
 0xb4f   : > { %4338 = vmatmul.mubr.msk.f32.vlgmr.msra.gmra.mrb[14].mxu0 %vm765_vm0, %v2094_v7  ;;  %v3288_v7 = vld [vmem:[#allocation8 + $0x90] sm:$0xff] }
 0xb50   : > { %4575 = vmatpush3.bf16.msra.mxu0 %v5807_v43  ;;  %4362 = vmatprep.mubr.msk.f32.mxu0 %vm765_vm0, %v2657_v8  ;;  %v3290_v8 = vld [vmem:[#allocation8 + $0xb0] sm:$0xff] }
 0xb51   : > { %4577 = vmatprep.subr.bf16.mxu0 %v5813_v49  ;;  %v4640_v13 = vpack.c.bf16 %v3290_v8, %v3288_v7  ;;  %v3137_v7 = vld [vmem:[#allocation8 + $0x1e0] sm:$0xff] }
 0xb54   : > { %4579 = vmatpush3.bf16.msra.mxu0 %v5813_v49 }
 0xb55   : > { %4591 = vmatprep.subr.bf16.mxu0 %v5821_v50 }
 0xb57   : > { %4363 = vmatmul.mubr.msk.f32.vlgmr.msra.gmra.mrb[14].mxu0 %vm765_vm0, %v2658_v47  ;;  %v3120_v47 = vld [vmem:[#allocation8 + $0xc8] sm:$0xff] }
 0xb58   : > { %4593 = vmatpush3.bf16.msra.mxu0 %v5821_v50  ;;  %v3108_v50 = vld [vmem:[#allocation8 + $0x8] sm:$0xff] }
 0xb59   : > { %4595 = vmatprep.subr.bf16.mxu0 %v5827_v61 }
 0xb5c   : > { %4597 = vmatpush3.bf16.msra.mxu0 %v5827_v61  ;;  %v4598_v61 = vpack.c.bf16 %v3110_v23, %v3108_v50  ;;  %v3292_v50 = vld [vmem:[#allocation8 + $0xd0] sm:$0xff] }
 0xb5d   : > { %4631 = vmatprep.subr.bf16.mxu0 %v4630_v26  ;;  %v3294_v23 = vld [vmem:[#allocation8 + $0xf0] sm:$0xff]  ;;  %v3299_v26 = vld [vmem:[#allocation8 + $0x138] sm:$0xff] }
 0xb5e   : > { %4599 = vmatprep.subr.bf16.mxu1 %v4598_v61  ;;  %v4644_v39 = vpack.c.bf16 %v3294_v23, %v3292_v50  ;;  %v3124_v61 = vld [vmem:[#allocation8 + $0x108] sm:$0xff]  ;;  %v4646_v4 = vpack.c.bf16 %v3299_v26, %v3297_v25 }
 0xb5f   : > { %4601 = vmatpush1.bf16.msra.mxu1 %v4600_v27  ;;  %v4614_v62 = vpack.c.bf16 %v3126_v2, %v3124_v61  ;;  %v3123_v27 = vld [vmem:[#allocation8 + $0x100] sm:$0xff] }
 0xb60   : > { %4603 = vmatprep.subr.bf16.mxu1 %v4602_v37  ;;  %v4616_v6 = vpack.c.bf16 %v3125_v32, %v3123_v27  ;;  %v3130_v37 = vld [vmem:[#allocation8 + $0x168] sm:$0xff] }
 0xb61   : > { %v4618_v21 = vpack.c.bf16 %v3130_v37, %v3128_v59  ;;  %v3264_v37 = vld [vmem:[#allocation10 + $0x80] sm:$0xff] }
 0xb63   : > { %4605 = vmatpush1.bf16.msra.mxu1 %v4604_v42  ;;  %v3127_v42 = vld [vmem:[#allocation8 + $0x140] sm:$0xff] }
 0xb9e   : > { %v2850_v30 = vpop.xlane.xlu0 %2849 }
 0xba2   : > { %v3043_v33 = vpop.xlane.xlu0 %3042 }
 0xba3   : > { %v2847_v12 = vpop.xlane.xlu1 %2846  ;;  %v3050_v44 = vmul.f32 0.0078125, %v3043_v33  ;;  %v4620_v33 = vpack.c.bf16 %v3129_v15, %v3127_v42 }
 0xba4   : > { %4957 = vrcp.f32 %v2847_v12  ;;  %v3122_v12 = vld [vmem:[#allocation8 + $0xe8] sm:$0xff] }
 0xba5   : > { %4959 = vrcp.f32 %v2850_v30  ;;  %v5908_v45 = vsub.f32 %v5870_v18, %v3050_v44  ;;  %v3116_v18 = vld [vmem:[#allocation8 + $0x88] sm:$0xff]  ;;  %v3293_v30 = vld [vmem:[#allocation8 + $0xd8] sm:$0xff] }
 0xba6   : > { %v3132_v44 = vld [vmem:[#allocation8 + $0x188] sm:$0xff] }
 0xba7   : > { %v3041_v63 = vpop.xlane.xlu1 %3040  ;;  %v3058_v9 = vmul.f32 %v5908_v45, %v5908_v45 }
 0xba8   : > { %v3049_v35 = vmul.f32 0.0078125, %v3041_v63  ;;  %v3302_v63 = vld [vmem:[#allocation8 + $0x170] sm:$0xff] }
 0xbaa   : > { %v5914_v10 = vsub.f32 %v5879_v51, %v3049_v35  ;;  %v4606_v51 = vpack.c.bf16 %v3118_v54, %v3116_v18  ;;  %v3134_v35 = vld [vmem:[#allocation8 + $0x1a8] sm:$0xff]  ;;  %v3306_v18 = vld [vmem:[#allocation8 + $0x1b0] sm:$0xff] }
 0xbac   : > { %4607 = vmatprep.subr.bf16.mxu1 %v4606_v51  ;;  %v3138_v51 = vld [vmem:[#allocation8 + $0x1e8] sm:$0xff] }
 0xbad   : > { %4609 = vmatpush1.bf16.msra.mxu1 %v4608_v5  ;;  %v4626_v24 = vpack.c.bf16 %v3138_v51, %v3136_v55  ;;  %v3135_v5 = vld [vmem:[#allocation8 + $0x1c0] sm:$0xff]  ;;  %v3442_v55 = vld [vmem:[#allocation10 + $0x1a8] sm:$0xff] }
 0xbae   : > { %v4958_v11 = vpop.eup %4957 }
 0xbaf   : > { %v4960_v49 = vpop.eup %4959 }
 0xbe8   : > { %v4378_v43 = vpop.f32.mrb[30].mxu1 }
 0xbe9   : > { %v2929_v46 = vpop.f32.mrb[31].mxu1  ;;  %v2941_v1 = vmul.f32 %v4960_v49, %v4378_v43  ;;  %v4610_v43 = vpack.c.bf16 %v3122_v12, %v3120_v47  ;;  %v3121_v49 = vld [vmem:[#allocation8 + $0xe0] sm:$0xff]  ;;  %v3310_v47 = vld [vmem:[#allocation8 + $0x1f0] sm:$0xff]  ;;  %v4628_v12 = vpack.c.bf16 %v3137_v7, %v3135_v5  ;;  %v3426_v7 = vld [vmem:[#allocation10 + $0x128] sm:$0xff] }
 0xbea   : > { %v2940_v22 = vmul.f32 %v4958_v11, %v2929_v46  ;;  %v3295_v11 = vld [vmem:[#allocation8 + $0xf8] sm:$0xff]  ;;  %v3119_v46 = vld [vmem:[#allocation8 + $0xc0] sm:$0xff] }
 0xbeb   : > { %4611 = vmatprep.subr.bf16.mxu1 %v4610_v43 }
 0xbec   : > { %4387 = vmatprep.mubr.msk.f32.mxu0 %vm765_vm0, %v2940_v22  ;;  %v4642_v22 = vpack.c.bf16 %v3295_v11, %v3293_v30 }
 0xbed   : > { %4388 = vmatmul.mubr.msk.f32.vlgmr.msra.gmra.mrb[14].mxu0 %vm765_vm0, %v2941_v1  ;;  %v4612_v1 = vpack.c.bf16 %v3121_v49, %v3119_v46 }
 0xbee   : > { %3388 = vmatprep.mubr.f32.mxu0 %v5209_v0  ;;  %4633 = vmatpush1.bf16.msra.mxu0 %v4632_v28  ;;  %v3296_v28 = vld [vmem:[#allocation8 + $0x110] sm:$0xff] }
 0xbef   : > { %4635 = vmatprep.subr.bf16.mxu0 %v4634_v36  ;;  %4613 = vmatpush1.bf16.msra.mxu1 %v4612_v1  ;;  %v4648_v29 = vpack.c.bf16 %v3298_v31, %v3296_v28  ;;  %v3301_v36 = vld [vmem:[#allocation8 + $0x158] sm:$0xff] }
 0xbf0   : > { %4615 = vmatprep.subr.bf16.mxu1 %v4614_v62  ;;  %v4650_v58 = vpack.c.bf16 %v3303_v14, %v3301_v36  ;;  %v3265_v14 = vld [vmem:[#allocation10 + $0x88] sm:$0xff] }
 0xbf1   : > { %v4694_v42 = vpack.c.bf16 %v3265_v14, %v3264_v37  ;;  %v3257_v37 = vld [vmem:[#allocation10 + $0x48] sm:$0xff]  ;;  %v3448_v14 = vld [vmem:[#allocation10 + $0x1d8] sm:$0xff] }
 0xbf2   : > { %4637 = vmatpush1.bf16.msra.mxu0 %v4636_v20  ;;  %v3300_v20 = vld [vmem:[#allocation8 + $0x150] sm:$0xff] }
 0xbf3   : > { %4639 = vmatprep.subr.bf16.mxu0 %v4638_v3  ;;  %4617 = vmatpush1.bf16.msra.mxu1 %v4616_v6  ;;  %v3311_v3 = vld [vmem:[#allocation8 + $0x1f8] sm:$0xff]  ;;  %v5945_v6 = vld [vmem:[%s6064_s10] ss:$0 sm:$0xff] }
 0xbf4   : > { %4619 = vmatprep.subr.bf16.mxu1 %v4618_v21  ;;  %v4658_v8 = vpack.c.bf16 %v3311_v3, %v3309_v56  ;;  %v3421_v21 = vld [vmem:[#allocation10 + $0x100] sm:$0xff] }
 0xbf5   : > { %v3425_v3 = vld [vmem:[#allocation10 + $0x120] sm:$0xff] }
 0xbf6   : > { %4641 = vmatpush1.bf16.msra.mxu0 %v4640_v13  ;;  %v3308_v13 = vld [vmem:[#allocation8 + $0x1d0] sm:$0xff] }
 0xbf7   : > { %4643 = vmatprep.subr.bf16.mxu0 %v4642_v22  ;;  %4621 = vmatpush1.bf16.msra.mxu1 %v4620_v33  ;;  %v4660_v30 = vpack.c.bf16 %v3310_v47, %v3308_v13  ;;  %v3249_v33 = vld [vmem:[#allocation10 + $0x8] sm:$0xff]  ;;  %v4672_v47 = vpack.c.bf16 %v3426_v7, %v3425_v3  ;;  %v3451_v3 = vld [vmem:[#allocation10 + $0x1f0] sm:$0xff] }
 0xbf8   : > { %v3253_v13 = vld [vmem:[#allocation10 + $0x28] sm:$0xff]  ;;  %v3278_v7 = vld [vmem:[#allocation10 + $0xf0] sm:$0xff] }
 0xbfa   : > { %4645 = vmatpush1.bf16.msra.mxu0 %v4644_v39 }
 0xbfb   : > { %4647 = vmatprep.subr.bf16.mxu0 %v4646_v4 }
 0xbfe   : > { %4649 = vmatpush1.bf16.msra.mxu0 %v4648_v29  ;;  %v3438_v29 = vld [vmem:[#allocation10 + $0x188] sm:$0xff] }
 0xbff   : > { %4651 = vmatprep.subr.bf16.mxu0 %v4650_v58  ;;  %v3422_v58 = vld [vmem:[#allocation10 + $0x108] sm:$0xff] }
 0xc00   : > { %v4664_v15 = vpack.c.bf16 %v3422_v58, %v3421_v21  ;;  %v3274_v21 = vld [vmem:[#allocation10 + $0xd0] sm:$0xff]  ;;  %v3275_v58 = vld [vmem:[#allocation10 + $0xd8] sm:$0xff] }
 0xcc0   : > { %v4389_v38 = vpop.f32.mrb[14].mxu0 }
 0xcc1   : > { %v3035_v48 = vadd.f32 %v4389_v38, %v5865_v34  ;;  %v3014_v60 = vpop.f32.mrb[15].mxu0  ;;  %v4652_v38 = vpack.c.bf16 %v3302_v63, %v3300_v20  ;;  %v3248_v20 = vld [vmem:[#allocation10] sm:$0xff]  ;;  %v3439_v63 = vld [vmem:[#allocation10 + $0x190] sm:$0xff] }
 0xcc2   : > { %v3034_v41 = vadd.f32 %v5865_v34, %v3014_v60  ;;  %v3057_v34 = vmul.f32 %v5914_v10, %v5914_v10  ;;  %v3305_v60 = vld [vmem:[#allocation8 + $0x198] sm:$0xff] }
 0xcc3   : > { %v5911_v40 = vadd.f32 %v4978_v57, %v3035_v48  ;;  %v4622_v48 = vpack.c.bf16 %v3134_v35, %v3132_v44  ;;  %v3131_v57 = vld [vmem:[#allocation8 + $0x180] sm:$0xff]  ;;  %4653 = vmatpush1.bf16.msra.mxu0 %v4652_v38  ;;  %v4696_v44 = vpack.c.bf16 %v3249_v33, %v3248_v20  ;;  %v3440_v35 = vld [vmem:[#allocation10 + $0x198] sm:$0xff]  ;;  %v3266_v38 = vld [vmem:[#allocation10 + $0x90] sm:$0xff] }
 0xcc4   : > { %v5917_v53 = vadd.f32 %v4979_v52, %v3034_v41  ;;  %v3307_v41 = vld [vmem:[#allocation8 + $0x1b8] sm:$0xff]  ;;  %v3431_v33 = vld [vmem:[#allocation10 + $0x150] sm:$0xff] }
 0xcc5   : > { %3046 = vadd.xlane.f32.xlu0 %v5911_v40  ;;  %v4654_v52 = vpack.c.bf16 %v3307_v41, %v3305_v60  ;;  %4623 = vmatprep.subr.bf16.mxu1 %v4622_v48  ;;  %v3267_v48 = vld [vmem:[#allocation10 + $0x98] sm:$0xff]  ;;  %v4666_v60 = vpack.c.bf16 %v3440_v35, %v3439_v63  ;;  %v4714_v35 = vpack.c.bf16 %v3275_v58, %v3274_v21 }
 0xcc6   : > { %3044 = vadd.xlane.f32.xlu1 %v5917_v53  ;;  %v4698_v41 = vpack.c.bf16 %v3267_v48, %v3266_v38  ;;  %v3432_v63 = vld [vmem:[#allocation10 + $0x158] sm:$0xff]  ;;  %v3449_v48 = vld [vmem:[#allocation10 + $0x1e0] sm:$0xff] }
 0xcc7   : > { %4655 = vmatprep.subr.bf16.mxu0 %v4654_v52  ;;  %v3424_v52 = vld [vmem:[#allocation10 + $0x118] sm:$0xff] }
 0xcc8   : > { %v3259_v38 = vld [vmem:[#allocation10 + $0x58] sm:$0xff] }
 0xcc9   : > { %3063 = vadd.xlane.f32.xlu0 %v3058_v9  ;;  %v3133_v9 = vld [vmem:[#allocation8 + $0x1a0] sm:$0xff] }
 0xcca   : > { %3061 = vadd.xlane.f32.xlu1 %v3057_v34  ;;  %v3304_v34 = vld [vmem:[#allocation8 + $0x190] sm:$0xff]  ;;  %v4624_v54 = vpack.c.bf16 %v3133_v9, %v3131_v57 }
 0xccb   : > { %v4656_v17 = vpack.c.bf16 %v3306_v18, %v3304_v34  ;;  %v3423_v57 = vld [vmem:[#allocation10 + $0x110] sm:$0xff]  ;;  %v3251_v18 = vld [vmem:[#allocation10 + $0x18] sm:$0xff] }
 0xccc   : > { %4625 = vmatpush1.bf16.msra.mxu1 %v4624_v54  ;;  %v3250_v9 = vld [vmem:[#allocation10 + $0x10] sm:$0xff]  ;;  %v4668_v34 = vpack.c.bf16 %v3424_v52, %v3423_v57  ;;  %v3441_v54 = vld [vmem:[#allocation10 + $0x1a0] sm:$0xff]  ;;  %v3277_v57 = vld [vmem:[#allocation10 + $0xe8] sm:$0xff]  ;;  %v4684_v52 = vpack.c.bf16 %v3432_v63, %v3431_v33 }
 0xccd   : > { %4657 = vmatpush1.bf16.msra.mxu0 %v4656_v17  ;;  %4627 = vmatprep.subr.bf16.mxu1 %v4626_v24  ;;  %v4700_v51 = vpack.c.bf16 %v3251_v18, %v3250_v9  ;;  %v4670_v56 = vpack.c.bf16 %v3442_v55, %v3441_v54  ;;  %v3268_v17 = vld [vmem:[#allocation10 + $0xa0] sm:$0xff]  ;;  %v3269_v24 = vld [vmem:[#allocation10 + $0xa8] sm:$0xff] }
 0xcce   : > { %4659 = vmatprep.subr.bf16.mxu0 %v4658_v8  ;;  %v4702_v5 = vpack.c.bf16 %v3269_v24, %v3268_v17  ;;  %v3252_v8 = vld [vmem:[#allocation10 + $0x20] sm:$0xff]  ;;  %v3434_v55 = vld [vmem:[#allocation10 + $0x168] sm:$0xff] }
 0xccf   : > { %v3433_v54 = vld [vmem:[#allocation10 + $0x160] sm:$0xff]  ;;  %v3261_v17 = vld [vmem:[#allocation10 + $0x68] sm:$0xff] }
 0xcd0   : > { %4629 = vmatpush1.bf16.msra.mxu1 %v4628_v12  ;;  %v3443_v12 = vld [vmem:[#allocation10 + $0x1b0] sm:$0xff] }
 0xcd1   : > { %4661 = vmatpush1.bf16.msra.mxu0 %v4660_v30  ;;  %v3444_v30 = vld [vmem:[#allocation10 + $0x1b8] sm:$0xff] }
 0xcd2   : > { %4695 = vmatprep.subr.bf16.mxu0 %v4694_v42 }
 0xd52   : > { %v3047_v43 = vpop.xlane.xlu0 %3046 }
 0xd53   : > { %v3052_v11 = vmul.f32 0.0078125, %v3047_v43  ;;  %v3045_v46 = vpop.xlane.xlu1 %3044  ;;  %v3270_v43 = vld [vmem:[#allocation10 + $0xb0] sm:$0xff] }
 0xd54   : > { %v3051_v49 = vmul.f32 0.0078125, %v3045_v46  ;;  %v4674_v46 = vpack.c.bf16 %v3444_v30, %v3443_v12  ;;  %v3436_v12 = vld [vmem:[#allocation10 + $0x178] sm:$0xff] }
 0xd55   : > { %v5926_v22 = vsub.f32 %v5911_v40, %v3052_v11  ;;  %v4704_v11 = vpack.c.bf16 %v3253_v13, %v3252_v8  ;;  %v3279_v13 = vld [vmem:[#allocation10 + $0xf8] sm:$0xff] }
 0xd56   : > { %v5929_v1 = vsub.f32 %v5917_v53, %v3051_v49  ;;  %v3064_v50 = vpop.xlane.xlu0 %3063  ;;  %v5938_v53 = vld [vmem:[%s6063_s9] ss:$0 sm:$0xff]  ;;  %v3271_v49 = vld [vmem:[#allocation10 + $0xb8] sm:$0xff]  ;;  %v4722_v30 = vpack.c.bf16 %v3279_v13, %v3278_v7 }
 0xd57   : > { %v3070_v23 = vmul.f32 0.0078125, %v3064_v50  ;;  %v3062_v39 = vpop.xlane.xlu1 %3061  ;;  %v3060_v61 = vmul.f32 %v5926_v22, %v5926_v22  ;;  %v3427_v50 = vld [vmem:[#allocation10 + $0x130] sm:$0xff] }
 0xd58   : > { %v3069_v2 = vmul.f32 0.0078125, %v3062_v39  ;;  %v3059_v25 = vmul.f32 %v5929_v1, %v5929_v1  ;;  %v4706_v39 = vpack.c.bf16 %v3271_v49, %v3270_v43 }
 0xd59   : > { %v3074_v62 = vadd.f32 1e-05, %v3070_v23  ;;  %3067 = vadd.xlane.f32.xlu0 %v3060_v61  ;;  %v3428_v23 = vld [vmem:[#allocation10 + $0x138] sm:$0xff]  ;;  %v3254_v61 = vld [vmem:[#allocation10 + $0x30] sm:$0xff] }
 0xd5a   : > { %v3073_v26 = vadd.f32 1e-05, %v3069_v2  ;;  %3065 = vadd.xlane.f32.xlu1 %v3059_v25  ;;  %v3255_v2 = vld [vmem:[#allocation10 + $0x38] sm:$0xff]  ;;  %v3445_v25 = vld [vmem:[#allocation10 + $0x1c0] sm:$0xff] }
 0xd5b   : > { %4961 = vrsqrt.f32 %v3074_v62  ;;  %v3446_v62 = vld [vmem:[#allocation10 + $0x1c8] sm:$0xff] }
 0xd5c   : > { %4963 = vrsqrt.f32 %v3073_v26  ;;  %v3272_v26 = vld [vmem:[#allocation10 + $0xc0] sm:$0xff] }
 0xd65   : > { %v4962_v40 = vpop.eup %4961 }
 0xd66   : > { %v4964_v27 = vpop.eup %4963  ;;  %v3082_v4 = vmul.f32 %v4962_v40, %v5908_v45  ;;  %v3273_v40 = vld [vmem:[#allocation10 + $0xc8] sm:$0xff] }
 0xd67   : > { %v3081_v32 = vmul.f32 %v4964_v27, %v5914_v10  ;;  %v3437_v10 = vld [vmem:[#allocation10 + $0x180] sm:$0xff]  ;;  %v4676_v27 = vpack.c.bf16 %v3428_v23, %v3427_v50 }
 0xd68   : > { %v3093_v59 = vmul.f32 %v5938_v53, %v3082_v4  ;;  %v4662_v36 = vpack.c.bf16 %v3438_v29, %v3437_v10  ;;  %v4678_v4 = vpack.c.bf16 %v3446_v62, %v3445_v25  ;;  %v3256_v10 = vld [vmem:[#allocation10 + $0x40] sm:$0xff]  ;;  %v4710_v29 = vpack.c.bf16 %v3273_v40, %v3272_v26 }
 0xd69   : > { %v3092_v28 = vmul.f32 %v5938_v53, %v3081_v32  ;;  %v4708_v32 = vpack.c.bf16 %v3255_v2, %v3254_v61 }
 0xd6a   : > { %v5957_v45 = vadd.f32 %v5945_v6, %v3093_v59  ;;  %4663 = vmatprep.subr.bf16.mxu1 %v4662_v36  ;;  %v3430_v59 = vld [vmem:[#allocation10 + $0x148] sm:$0xff]  ;;  %v3447_v36 = vld [vmem:[#allocation10 + $0x1d0] sm:$0xff] }
 0xd6b   : > { %v5949_v31 = vadd.f32 %v5945_v6, %v3092_v28  ;;  %v3429_v28 = vld [vmem:[#allocation10 + $0x140] sm:$0xff]  ;;  %v4682_v20 = vpack.c.bf16 %v3448_v14, %v3447_v36 }
 0xd6c   : > { %v4680_v42 = vpack.c.bf16 %v3430_v59, %v3429_v28 }
 0xd6d   : > { %3216 = vmatmul.mubr.f32.vlgmr.msra.gmra.mrb[32].mxu1 %v5949_v31  ;;  %3389 = vmatmul.mubr.f32.vlgmr.msra.gmra.mrb[16].mxu0 %v5949_v31 }
 0xd6e   : > { %3221 = vmatprep.mubr.f32.mxu1 %v5209_v0  ;;  %3394 = vmatprep.mubr.f32.mxu0 %v5209_v0 }
 0xd6f   : > { %4665 = vmatpush3.bf16.msra.mxu1 %v4664_v15  ;;  %4697 = vmatpush3.bf16.msra.mxu0 %v4696_v44  ;;  %v4712_v15 = vpack.c.bf16 %v3257_v37, %v3256_v10  ;;  %v3258_v44 = vld [vmem:[#allocation10 + $0x50] sm:$0xff] }
 0xd70   : > { %4667 = vmatprep.subr.bf16.mxu1 %v4666_v60  ;;  %4699 = vmatprep.subr.bf16.mxu0 %v4698_v41  ;;  %v3450_v60 = vld [vmem:[#allocation10 + $0x1e8] sm:$0xff]  ;;  %v3276_v41 = vld [vmem:[#allocation10 + $0xe0] sm:$0xff]  ;;  %v4716_v9 = vpack.c.bf16 %v3259_v38, %v3258_v44 }
 0xd71   : > { %3222 = vmatmul.mubr.f32.gmra.mrb[34].mxu1 %v5957_v45  ;;  %3395 = vmatmul.mubr.f32.gmra.mrb[18].mxu0 %v5957_v45  ;;  %v4718_v18 = vpack.c.bf16 %v3277_v57, %v3276_v41 }
 0xd72   : > { %3227 = vmatprep.mubr.f32.mxu1 %v5209_v0  ;;  %3400 = vmatprep.mubr.f32.mxu0 %v5209_v0 }
 0xd73   : > { %4669 = vmatpush3.bf16.msra.mxu1 %v4668_v34  ;;  %4701 = vmatpush3.bf16.msra.mxu0 %v4700_v51  ;;  %v4686_v34 = vpack.c.bf16 %v3450_v60, %v3449_v48  ;;  %v3260_v51 = vld [vmem:[#allocation10 + $0x60] sm:$0xff] }
 0xd74   : > { %4671 = vmatprep.subr.bf16.mxu1 %v4670_v56  ;;  %4703 = vmatprep.subr.bf16.mxu0 %v4702_v5  ;;  %v4688_v56 = vpack.c.bf16 %v3434_v55, %v3433_v54  ;;  %v4720_v24 = vpack.c.bf16 %v3261_v17, %v3260_v51  ;;  %v3452_v5 = vld [vmem:[#allocation10 + $0x1f8] sm:$0xff] }
 0xd75   : > { %v4690_v8 = vpack.c.bf16 %v3452_v5, %v3451_v3 }
 0xd77   : > { %4673 = vmatpush3.bf16.msra.mxu1 %v4672_v47  ;;  %4705 = vmatpush3.bf16.msra.mxu0 %v4704_v11  ;;  %v3435_v47 = vld [vmem:[#allocation10 + $0x170] sm:$0xff] }
 0xd78   : > { %4675 = vmatprep.subr.bf16.mxu1 %v4674_v46  ;;  %4707 = vmatprep.subr.bf16.mxu0 %v4706_v39  ;;  %v4692_v43 = vpack.c.bf16 %v3436_v12, %v3435_v47  ;;  %v3262_v11 = vld [vmem:[#allocation10 + $0x70] sm:$0xff]  ;;  %v3263_v46 = vld [vmem:[#allocation10 + $0x78] sm:$0xff] }
 0xd79   : > { %v4724_v49 = vpack.c.bf16 %v3263_v46, %v3262_v11 }
 0xd7b   : > { %4677 = vmatpush3.bf16.msra.mxu1 %v4676_v27  ;;  %4709 = vmatpush3.bf16.msra.mxu0 %v4708_v32 }
 0xd7c   : > { %4679 = vmatprep.subr.bf16.mxu1 %v4678_v4  ;;  %4711 = vmatprep.subr.bf16.mxu0 %v4710_v29 }
 0xd7f   : > { %4681 = vmatpush3.bf16.msra.mxu1 %v4680_v42  ;;  %4713 = vmatpush3.bf16.msra.mxu0 %v4712_v15 }
 0xd80   : > { %4683 = vmatprep.subr.bf16.mxu1 %v4682_v20  ;;  %4715 = vmatprep.subr.bf16.mxu0 %v4714_v35 }
 0xd83   : > { %4685 = vmatpush3.bf16.msra.mxu1 %v4684_v52  ;;  %4717 = vmatpush3.bf16.msra.mxu0 %v4716_v9 }
 0xd84   : > { %4687 = vmatprep.subr.bf16.mxu1 %v4686_v34  ;;  %4719 = vmatprep.subr.bf16.mxu0 %v4718_v18 }
 0xd87   : > { %4689 = vmatpush3.bf16.msra.mxu1 %v4688_v56  ;;  %4721 = vmatpush3.bf16.msra.mxu0 %v4720_v24 }
 0xd88   : > { %4691 = vmatprep.subr.bf16.mxu1 %v4690_v8  ;;  %4723 = vmatprep.subr.bf16.mxu0 %v4722_v30 }
 0xd8b   : > { %4693 = vmatpush3.bf16.msra.mxu1 %v4692_v43  ;;  %4725 = vmatpush3.bf16.msra.mxu0 %v4724_v49 }
 0xde6   : > { %v3068_v50 = vpop.xlane.xlu0 %3067 }
 0xde7   : > { %v3072_v23 = vmul.f32 0.0078125, %v3068_v50  ;;  %v3066_v39 = vpop.xlane.xlu1 %3065 }
 0xde8   : > { %v3071_v61 = vmul.f32 0.0078125, %v3066_v39 }
 0xde9   : > { %v3076_v2 = vadd.f32 1e-05, %v3072_v23 }
 0xdea   : > { %v3075_v25 = vadd.f32 1e-05, %v3071_v61 }
 0xdeb   : > { %4965 = vrsqrt.f32 %v3076_v2 }
 0xdec   : > { %4967 = vrsqrt.f32 %v3075_v25 }
 0xdf5   : > { %v4966_v62 = vpop.eup %4965 }
 0xdf6   : > { %v4968_v26 = vpop.eup %4967  ;;  %v3084_v27 = vmul.f32 %v4966_v62, %v5926_v22  ;;  %v3139_v22 = vld [vmem:[%s6060_s6] sm:$0x3] }
 0xdf7   : > { %v3083_v40 = vmul.f32 %v4968_v26, %v5929_v1  ;;  %v3312_v1 = vld [vmem:[%s6060_s6 + $0x2] sm:$0x3] }
 0xdf8   : > { %v3095_v28 = vmul.f32 %v5938_v53, %v3084_v27  ;;  %v3317_v10 = vrot.slane %v3312_v1, %v5539_v16 }
 0xdf9   : > { %v3094_v32 = vmul.f32 %v5938_v53, %v3083_v40  ;;  %v3144_v53 = vrot.slane %v3139_v22, %v5539_v16 }
 0xdfa   : > { %v5975_v59 = vadd.f32 %v5945_v6, %v3095_v28 }
 0xdfb   : > { %v5967_v4 = vadd.f32 %v5945_v6, %v3094_v32  ;;  %v3321_v6 = vrot.slane %v3312_v1, %v5547_v19 }
 0xdfd   : > { %3228 = vmatmul.mubr.f32.gmra.mrb[36].mxu1 %v5967_v4  ;;  %3401 = vmatmul.mubr.f32.gmra.mrb[20].mxu0 %v5967_v4 }
 0xdfe   : > { %3233 = vmatprep.mubr.f32.mxu1 %v5209_v0  ;;  %3406 = vmatprep.mubr.f32.mxu0 %v5209_v0  ;;  %v3148_v0 = vrot.slane %v3139_v22, %v5547_v19  ;;  %v3919_v22 = vld [vmem:[%s6098_s21] ss:$0 sm:$0xff]  ;;  %s3709_s21 = scalar_lea.sflag [#allocation4], %s5503_s13 }
 0xe01   : > { %3234 = vmatmul.mubr.f32.gmra.mrb[38].mxu1 %v5975_v59  ;;  %3407 = vmatmul.mubr.f32.gmra.mrb[22].mxu0 %v5975_v59 }
 0xe40   : > { %v3217_v29 = vpop.f32.mrb[32].mxu1  ;;  %v3390_v37 = vpop.f32.mrb[16].mxu0 }
 0xe41   : > { %v3218_v36 = vadd.f32 %v3217_v29, %v3144_v53  ;;  %v3391_v14 = vadd.f32 %v3390_v37, %v3317_v10  ;;  %v3219_v21 = vpop.f32.mrb[33].mxu1  ;;  %v3392_v58 = vpop.f32.mrb[17].mxu0 }
 0xe42   : > { %v3220_v42 = vadd.f32 %v3219_v21, %v3148_v0  ;;  %v3393_v15 = vadd.f32 %v3392_v58, %v3321_v6 }
 0xe43   : > { %v3240_v35 = vmax.f32 %v3218_v36, 0.0  ;;  %v3413_v38 = vmax.f32 %v3391_v14, 0.0 }
 0xe44   : > { %v3241_v20 = vmax.f32 %v3220_v42, 0.0  ;;  %v3414_v33 = vmax.f32 %v3393_v15, 0.0  ;;  %v3223_v63 = vpop.f32.mrb[34].mxu1  ;;  %v3396_v44 = vpop.f32.mrb[18].mxu0 }
 0xe45   : > { %v3224_v48 = vadd.f32 %v3223_v63, %v3144_v53  ;;  %v3397_v16 = vadd.f32 %v3396_v44, %v3317_v10  ;;  %v3225_v60 = vpop.f32.mrb[35].mxu1  ;;  %v3398_v41 = vpop.f32.mrb[19].mxu0 }
 0xe46   : > { %v3226_v57 = vadd.f32 %v3225_v60, %v3148_v0  ;;  %v3399_v19 = vadd.f32 %v3398_v41, %v3321_v6  ;;  %3517 = vmatprep.mubr.f32.mxu1 %v3414_v33  ;;  %3602 = vmatprep.mubr.f32.mxu0 %v3241_v20 }
 0xe47   : > { %3518 = vmatmul.mubr.f32.vlgmr.msra.gmra.mrb[40].mxu1 %v3413_v38  ;;  %3603 = vmatmul.mubr.f32.vlgmr.msra.gmra.mrb[24].mxu0 %v3240_v35  ;;  %v3242_v34 = vmax.f32 %v3224_v48, 0.0  ;;  %v3415_v18 = vmax.f32 %v3397_v16, 0.0 }
 0xe48   : > { %v3243_v52 = vmax.f32 %v3226_v57, 0.0  ;;  %v3416_v9 = vmax.f32 %v3399_v19, 0.0 }
 0xe4a   : > { %3522 = vmatprep.mubr.f32.mxu1 %v3416_v9  ;;  %3607 = vmatprep.mubr.f32.mxu0 %v3243_v52 }
 0xe4b   : > { %3523 = vmatmul.mubr.f32.gmra.mrb[42].mxu1 %v3415_v18  ;;  %3608 = vmatmul.mubr.f32.gmra.mrb[26].mxu0 %v3242_v34 }
 0xed0   : > { %v3229_v54 = vpop.f32.mrb[36].mxu1  ;;  %v3402_v55 = vpop.f32.mrb[20].mxu0 }
 0xed1   : > { %v3230_v51 = vadd.f32 %v3229_v54, %v3144_v53  ;;  %v3403_v56 = vadd.f32 %v3402_v55, %v3317_v10  ;;  %v3231_v17 = vpop.f32.mrb[37].mxu1  ;;  %v3404_v24 = vpop.f32.mrb[21].mxu0 }
 0xed2   : > { %v3232_v3 = vadd.f32 %v3231_v17, %v3148_v0  ;;  %v3405_v5 = vadd.f32 %v3404_v24, %v3321_v6 }
 0xed3   : > { %v3244_v12 = vmax.f32 %v3230_v51, 0.0  ;;  %v3417_v30 = vmax.f32 %v3403_v56, 0.0 }
 0xed4   : > { %v3245_v7 = vmax.f32 %v3232_v3, 0.0  ;;  %v3418_v8 = vmax.f32 %v3405_v5, 0.0  ;;  %v3235_v13 = vpop.f32.mrb[38].mxu1  ;;  %v3408_v47 = vpop.f32.mrb[22].mxu0 }
 0xed5   : > { %v3236_v43 = vadd.f32 %v3235_v13, %v3144_v53  ;;  %v3409_v11 = vadd.f32 %v3408_v47, %v3317_v10  ;;  %v3237_v46 = vpop.f32.mrb[39].mxu1  ;;  %v3410_v49 = vpop.f32.mrb[23].mxu0 }
 0xed6   : > { %v3238_v50 = vadd.f32 %v3237_v46, %v3148_v0  ;;  %v3411_v23 = vadd.f32 %v3410_v49, %v3321_v6  ;;  %3527 = vmatprep.mubr.f32.mxu1 %v3418_v8  ;;  %3612 = vmatprep.mubr.f32.mxu0 %v3245_v7 }
 0xed7   : > { %3528 = vmatmul.mubr.f32.gmra.mrb[44].mxu1 %v3417_v30  ;;  %3613 = vmatmul.mubr.f32.gmra.mrb[28].mxu0 %v3244_v12  ;;  %v3246_v2 = vmax.f32 %v3236_v43, 0.0  ;;  %v3419_v25 = vmax.f32 %v3409_v11, 0.0 }
 0xed8   : > { %v3247_v39 = vmax.f32 %v3238_v50, 0.0  ;;  %v3420_v61 = vmax.f32 %v3411_v23, 0.0 }
 0xeda   : > { %3532 = vmatprep.mubr.f32.mxu1 %v3420_v61  ;;  %3617 = vmatprep.mubr.f32.mxu0 %v3247_v39  ;;  %v3920_v39 = vld [vmem:[%s6099_s17] ss:$0 sm:$0xff]  ;;  %s5128_s17 = scalar_lea.vmem %s5127_s19, 1024 }
 0xedb   : > { %3533 = vmatmul.mubr.f32.gmra.mrb[46].mxu1 %v3419_v25  ;;  %3618 = vmatmul.mubr.f32.gmra.mrb[30].mxu0 %v3246_v2  ;;  %v3921_v2 = vld [vmem:[%s6100_s18] ss:$0 sm:$0xff]  ;;  %p5130_p2 = scmp.lt.s32.totalorder %s5128_s17, %s5122_s1 }
 0xedd   : > { %p5131_p1 = por %p5130_p2, %p5129_p12 }
 0xedf   : > { %p5132_p13 = pnand %p5131_p1, %p5125_p7 }
 0xf1a   : > { %v4096_v62 = vpop.f32.mrb[40].mxu1  ;;  %v4140_v26 = vpop.f32.mrb[24].mxu0 }
 0xf1b   : > { %v4097_v40 = vpop.f32.mrb[41].mxu1  ;;  %v4141_v27 = vpop.f32.mrb[25].mxu0 }
 0xf1c   : > { %v4098_v32 = vadd.f32 %v4097_v40, %v4096_v62  ;;  %v4142_v28 = vadd.f32 %v4141_v27, %v4140_v26 }
 0xf1e   : > { %v3605_v1 = vadd.f32 %v4142_v28, %v4098_v32  ;;  %v4099_v53 = vpop.f32.mrb[42].mxu1  ;;  %v4143_v10 = vpop.f32.mrb[26].mxu0 }
 0xf1f   : > { %v4100_v0 = vpop.f32.mrb[43].mxu1  ;;  %v4144_v6 = vpop.f32.mrb[27].mxu0 }
 0xf20   : > { %v4101_v29 = vadd.f32 %v4100_v0, %v4099_v53  ;;  %v4145_v37 = vadd.f32 %v4144_v6, %v4143_v10  ;;  %v3630_v36 = vadd.f32 %v3919_v22, %v3605_v1 }
 0xf22   : > { %v3610_v14 = vadd.f32 %v4145_v37, %v4101_v29  ;;  %v3634_v21 = vadd.f32 %v3630_v36, %v5949_v31 }
 0xf24   : > { %3638 = vadd.xlane.f32.xlu1 %v3634_v21  ;;  %v3631_v58 = vadd.f32 %v3919_v22, %v3610_v14 }
 0xf26   : > { %v3635_v42 = vadd.f32 %v3631_v58, %v5957_v45 }
 0xf28   : > { %3640 = vadd.xlane.f32.xlu0 %v3635_v42 }
 0xfaa   : > { %v4102_v15 = vpop.f32.mrb[44].mxu1  ;;  %v4146_v20 = vpop.f32.mrb[28].mxu0 }
 0xfab   : > { %v4103_v33 = vpop.f32.mrb[45].mxu1  ;;  %v4147_v63 = vpop.f32.mrb[29].mxu0 }
 0xfac   : > { %v4104_v44 = vadd.f32 %v4103_v33, %v4102_v15  ;;  %v4148_v35 = vadd.f32 %v4147_v63, %v4146_v20 }
 0xfae   : > { %v3615_v38 = vadd.f32 %v4148_v35, %v4104_v44  ;;  %v4105_v48 = vpop.f32.mrb[46].mxu1  ;;  %v4149_v16 = vpop.f32.mrb[30].mxu0 }
 0xfaf   : > { %v4106_v60 = vpop.f32.mrb[47].mxu1  ;;  %v4150_v41 = vpop.f32.mrb[31].mxu0 }
 0xfb0   : > { %v4107_v57 = vadd.f32 %v4106_v60, %v4105_v48  ;;  %v4151_v19 = vadd.f32 %v4150_v41, %v4149_v16  ;;  %v3632_v52 = vadd.f32 %v3919_v22, %v3615_v38 }
 0xfb1   : > { %v3639_v31 = vpop.xlane.xlu1 %3638 }
 0xfb2   : > { %v3620_v9 = vadd.f32 %v4151_v19, %v4107_v57  ;;  %v3646_v34 = vmul.f32 0.0078125, %v3639_v31  ;;  %v3636_v45 = vadd.f32 %v3632_v52, %v5967_v4 }
 0xfb4   : > { %v3650_v18 = vsub.f32 %v3634_v21, %v3646_v34  ;;  %3642 = vadd.xlane.f32.xlu1 %v3636_v45  ;;  %v3633_v54 = vadd.f32 %v3919_v22, %v3620_v9 }
 0xfb5   : > { %v3641_v55 = vpop.xlane.xlu0 %3640 }
 0xfb6   : > { %v3647_v51 = vmul.f32 0.0078125, %v3641_v55  ;;  %v3637_v56 = vadd.f32 %v3633_v54, %v5975_v59  ;;  %v3654_v17 = vmul.f32 %v3650_v18, %v3650_v18 }
 0xfb8   : > { %v3651_v24 = vsub.f32 %v3635_v42, %v3647_v51  ;;  %3644 = vadd.xlane.f32.xlu0 %v3637_v56  ;;  %3658 = vadd.xlane.f32.xlu1 %v3654_v17 }
 0xfba   : > { %v3655_v3 = vmul.f32 %v3651_v24, %v3651_v24 }
 0xfbc   : > { %3660 = vadd.xlane.f32.xlu0 %v3655_v3 }
0x1041   : > { %v3643_v5 = vpop.xlane.xlu1 %3642 }
0x1042   : > { %v3648_v7 = vmul.f32 0.0078125, %v3643_v5 }
0x1044   : > { %v3652_v8 = vsub.f32 %v3636_v45, %v3648_v7 }
0x1045   : > { %v3645_v13 = vpop.xlane.xlu0 %3644  ;;  %v3659_v47 = vpop.xlane.xlu1 %3658 }
0x1046   : > { %v3649_v12 = vmul.f32 0.0078125, %v3645_v13  ;;  %v3666_v4 = vmul.f32 0.0078125, %v3659_v47  ;;  %v3656_v30 = vmul.f32 %v3652_v8, %v3652_v8 }
0x1048   : > { %v3653_v43 = vsub.f32 %v3637_v56, %v3649_v12  ;;  %v3670_v11 = vadd.f32 1e-05, %v3666_v4  ;;  %3662 = vadd.xlane.f32.xlu1 %v3656_v30 }
0x1049   : > { %v3661_v46 = vpop.xlane.xlu0 %3660 }
0x104a   : > { %4969 = vrsqrt.f32 %v3670_v11  ;;  %v3667_v59 = vmul.f32 0.0078125, %v3661_v46  ;;  %v3657_v49 = vmul.f32 %v3653_v43, %v3653_v43 }
0x104c   : > { %v3671_v50 = vadd.f32 1e-05, %v3667_v59  ;;  %3664 = vadd.xlane.f32.xlu0 %v3657_v49 }
0x104e   : > { %4971 = vrsqrt.f32 %v3671_v50 }
0x1054   : > { %v4970_v23 = vpop.eup %4969 }
0x1055   : > { %v3678_v61 = vmul.f32 %v4970_v23, %v3650_v18 }
0x1057   : > { %v3689_v25 = vmul.f32 %v3920_v39, %v3678_v61 }
0x1058   : > { %v4972_v62 = vpop.eup %4971 }
0x1059   : > { %v3700_v26 = vadd.f32 %v3921_v2, %v3689_v25  ;;  %v3679_v40 = vmul.f32 %v4972_v62, %v3651_v24 }
0x105b   : > { %3704 = vst [vmem:[%s517_s25] sm:$0xff] %v3700_v26  ;;  %v3690_v27 = vmul.f32 %v3920_v39, %v3679_v40 }
0x105d   : > { %v3701_v32 = vadd.f32 %v3921_v2, %v3690_v27 }
0x105f   : > { %3705 = vst [vmem:[%s517_s25 + $0x8] sm:$0xff] %v3701_v32 }
0x10d5   : > { %v3663_v28 = vpop.xlane.xlu1 %3662 }
0x10d6   : > { %v3668_v22 = vmul.f32 0.0078125, %v3663_v28 }
0x10d8   : > { %v3672_v1 = vadd.f32 1e-05, %v3668_v22 }
0x10d9   : > { %v3665_v53 = vpop.xlane.xlu0 %3664 }
0x10da   : > { %4973 = vrsqrt.f32 %v3672_v1  ;;  %v3669_v10 = vmul.f32 0.0078125, %v3665_v53 }
0x10dc   : > { %v3673_v0 = vadd.f32 1e-05, %v3669_v10 }
0x10de   : > { %4975 = vrsqrt.f32 %v3673_v0 }
0x10e4   : > { %v4974_v6 = vpop.eup %4973 }
0x10e5   : > { %v3680_v29 = vmul.f32 %v4974_v6, %v3652_v8 }
0x10e7   : > { %v3691_v37 = vmul.f32 %v3920_v39, %v3680_v29 }
0x10e8   : > { %v4976_v36 = vpop.eup %4975 }
0x10e9   : > { %v3702_v14 = vadd.f32 %v3921_v2, %v3691_v37  ;;  %v3681_v21 = vmul.f32 %v4976_v36, %v3653_v43 }
0x10eb   : > { %3706 = vst [vmem:[%s517_s25 + $0x10] sm:$0xff] %v3702_v14  ;;  %v3692_v58 = vmul.f32 %v3920_v39, %v3681_v21 }
0x10ed   : > { %v3703_v42 = vadd.f32 %v3921_v2, %v3692_v58 }
0x10ef   : > { %3707 = vst [vmem:[%s517_s25 + $0x18] sm:$0xff] %v3703_v42 }
0x10f0   : > { %5135 = shalt.err (!%p5132_p13)
}
0x10f1   : > { %s5136_s20 = scalar_lea.hbm %s6008_s8, 512  ;;  %s5140_s25 = scalar_lea.hbm %s6101_s11, 1024 }
0x10f2   : > { %p5137_p9 = scmp.ne.s32.totalorder %s6008_s8, %s5136_s20  ;;  %p5141_p4 = scmp.lt.u32.totalorder %s6008_s8, %s6101_s11 }
0x10f3   : > { %p5142_p8 = scmp.lt.u32.totalorder %s5140_s25, %s5136_s20  ;;  %p5144_p3 = scmp.lt.u32.totalorder %s5136_s20, %s6008_s8 }
0x10f4   : > { %p5138_p0 = pnand %p5137_p9, %p5448_p10 }
0x10f5   : > { %p5143_p6 = por %p5142_p8, %p5141_p4 }
0x10f6   : > { %p5139_p11 = pneg %p5138_p0 }
0x10f7   : > { %p5145_p5 = por %p5144_p3, %p5143_p6 }
0x10f9   : > { %p5146_p7 = pnand %p5145_p5, %p5139_p11 }
0x10fb   : > { %5149 = shalt.err (!%p5146_p7)
}
0x10fc   : > { %s5214_s16 = smov 128   ;;  %s5215_s1 = smov 8  }
0x10fd   : > { %4756 = dma.vmem_to_hbm [thread:$0]  (%p5448_p10), %s6010_s12, 512, %s6008_s8, %s3709_s21, %s5214_s16, %s5214_s16, %s5215_s1  }
0x10fe PF: > { %s6102_s29 = sld [smem:[#allocation16_spill]]  ;;  %s6103_s19 = sld [smem:[#allocation17_spill]] }
0x10ff   : > { %p6105_p2 = scmp.ge.s32.totalorder %s5196_s28, 2 }
0x1104   : > { %s3738_s17 = sand.u32 1, %s6102_s29   ;;  %p6104_p12 = scmp.ne.s32.totalorder %s6103_s19, 0 }
0x1105   : > { %s3739_s20 = scalar_lea.sflag [#allocation4], %s3738_s17 }
0x1106   : > { %p4776_p1 = pnand %p6105_p2, %p6104_p12 }
0x1108   : > { %5179 = dma.done.wait (!%p4776_p1), %s3739_s20, 512  }
0x1109   : > { %5181 = vsyncadd (!%p4776_p1), %s3739_s20, 4294966784  ;;  %p28_p13 = scmp.ge.s32.totalorder %s5438_s15, 4   ;;  %s6106_s25 = smov %s5188_s26 }
0x110a   : > { %s6107_s26 = smov %s5192_s27  ;;  %s6108_s27 = smov %s5454_s30 }
0x110b   : > { %s6109_s28 = smov %s5438_s15  ;;  %30 = sbr.rel (!%p28_p13) target bundleno = 13 (0xd), region = 133 }
0x1112   :  { %3744 = vsyncpa [#allocation3], 1 }
0x1113   :  { %3746 = vsyncpa [#allocation3 + $0x1], 1 }
0x1114   :  { %3747 = vsyncpa [#allocation6], 1 }
0x1115   :  { %3748 = vsyncpa [#allocation9], 1 }
0x1116   :  { %3749 = vsyncpa [#allocation4], 1 }
0x1117   :  { %3751 = vsyncpa [#allocation4 + $0x1], 1 }

</bundles_post_ra>
